<compile_context>
chip_gen: v7x
topology: tpu7x:2x2x1
jax: 0.10.0
libtpu: 0.0.40
codegen_flags: <defaults>
</compile_context>

<pallas_src>
import jax
import jax.numpy as jnp
from jax.experimental import pallas as pl
from jax.experimental.pallas import tpu as pltpu

# ---------------- configuration (small, lane-aligned shapes) ----------------
D_OBJ    = 128          # object feature dim  (== output_dim)
D_PRED   = 128          # predicate feature dim (== output_dim_pred)
HIDDEN   = 128          # hidden_dim of each GraphTripleConv
N_LAYERS = 2
N_NODES  = 64
N_EDGES  = 256

_BF16 = jnp.bfloat16


# ------------------------------ fused kernel --------------------------------
def gconv_stack_kernel(sel_s_ref, sel_o_ref, scat_s_ref, scat_o_ref, inv_cnt_ref,
                       obj0_ref, pred0_ref,
                       w1s_ref, w1p_ref, w1o_ref, b1_ref,
                       w2_ref, b2_ref, w3_ref, b3_ref, w4_ref, b4_ref,
                       obj_ref, pred_ref):
    """One GraphTripleConv layer per grid step; obj/pred carried in the
    grid-resident output blocks (single launch for the whole stack)."""
    l = pl.program_id(0)

    @pl.when(l == 0)
    def _():
        obj_ref[...] = obj0_ref[...]
        pred_ref[...] = pred0_ref[...]

    def dot(a, b):
        return jnp.dot(a, b, preferred_element_type=jnp.float32)

    obj = obj_ref[...]            # (NP, D_OBJ)  bf16, carried across layers
    pred = pred_ref[...]          # (T,  D_PRED) bf16, carried across layers

    # gather obj[s_idx] / obj[o_idx] as one-hot matmuls on the MXU
    # (0/1 entries are exact in bf16 so the gather is lossless)
    cur_s = dot(sel_s_ref[...], obj).astype(_BF16)          # (T, D_OBJ)
    cur_o = dot(sel_o_ref[...], obj).astype(_BF16)

    # net1 layer 1: split row-blocks of W1 avoid concatenating [s | p | o]
    hid = (dot(cur_s, w1s_ref[...]) + dot(pred, w1p_ref[...])
           + dot(cur_o, w1o_ref[...]) + b1_ref[...])
    hid = jnp.maximum(hid, 0.0).astype(_BF16)               # (T, H)

    # net1 layer 2: fused [W2s | W2p | W2o]; lane-aligned output splits
    t = jnp.maximum(dot(hid, w2_ref[...]) + b2_ref[...], 0.0)   # (T, 2H+Dp) f32
    new_s = t[:, :HIDDEN].astype(_BF16)
    new_p = t[:, HIDDEN:HIDDEN + D_PRED].astype(_BF16)
    new_o = t[:, HIDDEN + D_PRED:].astype(_BF16)

    # mean scatter-pooling: 0/1 scatter matmuls (MXU) + f32 1/count scale (VPU)
    pooled = (dot(scat_s_ref[...], new_s)
              + dot(scat_o_ref[...], new_o)) * inv_cnt_ref[...]    # (NP, H) f32

    # net2 (2-layer MLP) + final ReLU
    h2 = jnp.maximum(dot(pooled.astype(_BF16), w3_ref[...]) + b3_ref[...], 0.0)
    new_obj = jnp.maximum(dot(h2.astype(_BF16), w4_ref[...]) + b4_ref[...], 0.0)

    obj_ref[...] = new_obj.astype(_BF16)
    pred_ref[...] = new_p


# ----------------------------- pallas wrapper --------------------------------
@jax.jit
def graph_triple_conv_net(node_features, edge_features, edge_flats, params):
    n_nodes = node_features.shape[0]
    n_edges = edge_features.shape[0]
    n_layers = len(params)
    NP = ((n_nodes + 127) // 128) * 128        # pad node axis to lane width

    s_idx = edge_flats[:, 0]
    o_idx = edge_flats[:, 1]

    # one-hot gather / scatter matrices on the padded node axis (exact in bf16)
    sel_s = jax.nn.one_hot(s_idx, NP, dtype=jnp.float32)    # (T, NP)
    sel_o = jax.nn.one_hot(o_idx, NP, dtype=jnp.float32)
    counts = sel_s.sum(axis=0) + sel_o.sum(axis=0)
    inv_cnt = (1.0 / jnp.maximum(counts, 1.0))[:, None]     # (NP, 1) f32
    scat_s = sel_s.T.astype(_BF16)                          # (NP, T)
    scat_o = sel_o.T.astype(_BF16)
    sel_s = sel_s.astype(_BF16)
    sel_o = sel_o.astype(_BF16)

    obj0 = jnp.zeros((NP, D_OBJ), _BF16).at[:n_nodes, :].set(
        node_features.astype(_BF16))
    pred0 = edge_features.astype(_BF16)

    # stack per-layer params: leading layer axis, selected by the index_map
    stk = lambda name, dt: jnp.stack([p[name] for p in params]).astype(dt)
    w1s, w1p, w1o = stk("w1s", _BF16), stk("w1p", _BF16), stk("w1o", _BF16)
    w2, w3, w4 = stk("w2", _BF16), stk("w3", _BF16), stk("w4", _BF16)
    b1, b2 = stk("b1", jnp.float32), stk("b2", jnp.float32)
    b3, b4 = stk("b3", jnp.float32), stk("b4", jnp.float32)

    const = lambda shape: pl.BlockSpec(shape, lambda l: (0,) * len(shape))
    perlayer = lambda shape: pl.BlockSpec((None,) + shape,
                                          lambda l: (l,) + (0,) * len(shape))

    fused = pl.pallas_call(
        gconv_stack_kernel,
        grid=(n_layers,),
        in_specs=[
            const((n_edges, NP)), const((n_edges, NP)),        # sel_s, sel_o
            const((NP, n_edges)), const((NP, n_edges)),        # scat_s, scat_o
            const((NP, 1)),                                    # inv_cnt
            const((NP, D_OBJ)), const((n_edges, D_PRED)),      # obj0, pred0
            perlayer((D_OBJ, HIDDEN)), perlayer((D_PRED, HIDDEN)),
            perlayer((D_OBJ, HIDDEN)), perlayer((1, HIDDEN)),
            perlayer((HIDDEN, 2 * HIDDEN + D_PRED)),
            perlayer((1, 2 * HIDDEN + D_PRED)),
            perlayer((HIDDEN, HIDDEN)), perlayer((1, HIDDEN)),
            perlayer((HIDDEN, D_OBJ)), perlayer((1, D_OBJ)),
        ],
        out_specs=(
            pl.BlockSpec((NP, D_OBJ), lambda l: (0, 0)),        # obj carry / out
            pl.BlockSpec((n_edges, D_PRED), lambda l: (0, 0)),  # pred carry / out
        ),
        out_shape=(jax.ShapeDtypeStruct((NP, D_OBJ), _BF16),
                   jax.ShapeDtypeStruct((n_edges, D_PRED), _BF16)),
        compiler_params=pltpu.CompilerParams(
            dimension_semantics=("arbitrary",),       # layer l+1 depends on layer l
            vmem_limit_bytes=32 * 1024 * 1024),
    )

    obj_pad, pred_out = fused(sel_s, sel_o, scat_s, scat_o, inv_cnt,
                              obj0, pred0,
                              w1s, w1p, w1o, b1, w2, b2, w3, b3, w4, b4)
    return obj_pad[:n_nodes], pred_out


# ------------------------- pure-JAX reference check --------------------------
def reference(node_features, edge_features, edge_flats, params):
    """Module-semantics forward (gather, concat, MLP, scatter_add, avg, net2,
    relu) in f32, with operands rounded to bf16 at the same points as the
    kernel so the comparison isolates Pallas plumbing from precision choice."""
    f32 = jnp.float32
    q = lambda x: x.astype(_BF16).astype(f32)     # bf16 operand rounding
    obj = q(node_features)
    pred = q(edge_features)
    n = obj.shape[0]
    s_idx = edge_flats[:, 0]
    o_idx = edge_flats[:, 1]
    for p in params:
        w1 = q(jnp.concatenate([p["w1s"], p["w1p"], p["w1o"]], axis=0))
        cur_s = obj[s_idx]
        cur_o = obj[o_idx]
        t_in = jnp.concatenate([cur_s, pred, cur_o], axis=1)
        hid = jnp.maximum(t_in @ w1 + p["b1"], 0.0)
        t = jnp.maximum(q(hid) @ q(p["w2"]) + p["b2"], 0.0)
        new_s = q(t[:, :HIDDEN])
        new_p = q(t[:, HIDDEN:HIDDEN + D_PRED])
        new_o = q(t[:, HIDDEN + D_PRED:])
        pooled = jnp.zeros((n, HIDDEN), f32).at[s_idx].add(new_s).at[o_idx].add(new_o)
        counts = jnp.zeros((n,), f32).at[s_idx].add(1.0).at[o_idx].add(1.0)
        pooled = pooled / jnp.maximum(counts, 1.0)[:, None]
        h2 = jnp.maximum(q(pooled) @ q(p["w3"]) + p["b3"], 0.0)
        obj = q(jnp.maximum(q(h2) @ q(p["w4"]) + p["b4"], 0.0))
        pred = new_p
    return obj, pred


# --------------------------- deterministic params ----------------------------
def make_params(key):
    layers = []
    fan_net1_in = 2 * D_OBJ + D_PRED
    for _ in range(N_LAYERS):
        keys = jax.random.split(key, 11)
        key = keys[0]

        def rnd(k, shape, fan_in):
            return jax.random.normal(k, shape, jnp.float32) * jnp.sqrt(2.0 / fan_in)

        layers.append(dict(
            w1s=rnd(keys[1], (D_OBJ, HIDDEN), fan_net1_in),
            w1p=rnd(keys[2], (D_PRED, HIDDEN), fan_net1_in),
            w1o=rnd(keys[3], (D_OBJ, HIDDEN), fan_net1_in),
            b1=jax.random.normal(keys[4], (1, HIDDEN), jnp.float32) * 0.05,
            w2=rnd(keys[5], (HIDDEN, 2 * HIDDEN + D_PRED), HIDDEN),
            b2=jax.random.normal(keys[6], (1, 2 * HIDDEN + D_PRED), jnp.float32) * 0.05,
            w3=rnd(keys[7], (HIDDEN, HIDDEN), HIDDEN),
            b3=jax.random.normal(keys[8], (1, HIDDEN), jnp.float32) * 0.05,
            w4=rnd(keys[9], (HIDDEN, D_OBJ), HIDDEN),
            b4=jax.random.normal(keys[10], (1, D_OBJ), jnp.float32) * 0.05,
        ))
    return layers


# ---------------------------------- main --------------------------------------
if __name__ == "__main__":
    key = jax.random.PRNGKey(0)
    k_obj, k_pred, k_s, k_o, k_par = jax.random.split(key, 5)

    node_features = jax.random.normal(k_obj, (N_NODES, D_OBJ), jnp.float32)
    edge_features = jax.random.normal(k_pred, (N_EDGES, D_PRED), jnp.float32)
    s_idx = jax.random.randint(k_s, (N_EDGES,), 0, N_NODES)
    o_idx = jax.random.randint(k_o, (N_EDGES,), 0, N_NODES)
    edge_flats = jnp.stack([s_idx, o_idx], axis=1)          # (T, 2): [src, dst]

    params = make_params(k_par)

    new_obj, new_pred = graph_triple_conv_net(node_features, edge_features,
                                              edge_flats, params)
    jax.block_until_ready((new_obj, new_pred))

    ref_obj, ref_pred = reference(node_features, edge_features, edge_flats, params)
    jax.block_until_ready((ref_obj, ref_pred))

    assert new_obj.shape == (N_NODES, D_OBJ)
    assert new_pred.shape == (N_EDGES, D_PRED)
    err_o = float(jnp.max(jnp.abs(new_obj.astype(jnp.float32) - ref_obj)))
    err_p = float(jnp.max(jnp.abs(new_pred.astype(jnp.float32) - ref_pred)))
    # kernel and reference share the same bf16 operand rounding; remaining
    # difference is f32 accumulation-order / 1-ulp averaging noise.
    assert err_o < 1e-2, err_o
    assert err_p < 1e-2, err_p
    print("KERNEL_OK")
</pallas_src>

<mosaic_0001>
module attributes {stable_mosaic.version = 11 : i64} {
  func.func @gconv_stack_kernel(%arg0: i32, %arg1: memref<256x128xbf16, #tpu.memory_space<vmem>>, %arg2: memref<256x128xbf16, #tpu.memory_space<vmem>>, %arg3: memref<128x256xbf16, #tpu.memory_space<vmem>>, %arg4: memref<128x256xbf16, #tpu.memory_space<vmem>>, %arg5: memref<128x1xf32, #tpu.memory_space<vmem>>, %arg6: memref<128x128xbf16, #tpu.memory_space<vmem>>, %arg7: memref<256x128xbf16, #tpu.memory_space<vmem>>, %arg8: memref<1x128x128xbf16, #tpu.memory_space<vmem>>, %arg9: memref<1x128x128xbf16, #tpu.memory_space<vmem>>, %arg10: memref<1x128x128xbf16, #tpu.memory_space<vmem>>, %arg11: memref<1x1x128xf32, #tpu.memory_space<vmem>>, %arg12: memref<1x128x384xbf16, #tpu.memory_space<vmem>>, %arg13: memref<1x1x384xf32, #tpu.memory_space<vmem>>, %arg14: memref<1x128x128xbf16, #tpu.memory_space<vmem>>, %arg15: memref<1x1x128xf32, #tpu.memory_space<vmem>>, %arg16: memref<1x128x128xbf16, #tpu.memory_space<vmem>>, %arg17: memref<1x1x128xf32, #tpu.memory_space<vmem>>, %arg18: memref<128x128xbf16, #tpu.memory_space<vmem>>, %arg19: memref<256x128xbf16, #tpu.memory_space<vmem>>) attributes {dimension_semantics = [#tpu.dimension_semantics<arbitrary>], iteration_bounds = array<i64: 2>, scalar_prefetch = 0 : i64, scratch_operands = 0 : i64, tpu.core_type = #tpu.core_type<tc>, window_params = [{pipeline_mode = #tpu.pipeline_mode<synchronous>, transform_indices = @transform_0, window_bounds = array<i64: 256, 128>}, {pipeline_mode = #tpu.pipeline_mode<synchronous>, transform_indices = @transform_1, window_bounds = array<i64: 256, 128>}, {pipeline_mode = #tpu.pipeline_mode<synchronous>, transform_indices = @transform_2, window_bounds = array<i64: 128, 256>}, {pipeline_mode = #tpu.pipeline_mode<synchronous>, transform_indices = @transform_3, window_bounds = array<i64: 128, 256>}, {pipeline_mode = #tpu.pipeline_mode<synchronous>, transform_indices = @transform_4, window_bounds = array<i64: 128, 1>}, {pipeline_mode = #tpu.pipeline_mode<synchronous>, transform_indices = @transform_5, window_bounds = array<i64: 128, 128>}, {pipeline_mode = #tpu.pipeline_mode<synchronous>, transform_indices = @transform_6, window_bounds = array<i64: 256, 128>}, {transform_indices = @transform_7, window_bounds = array<i64: 1, 128, 128>}, {transform_indices = @transform_8, window_bounds = array<i64: 1, 128, 128>}, {transform_indices = @transform_9, window_bounds = array<i64: 1, 128, 128>}, {transform_indices = @transform_10, window_bounds = array<i64: 1, 1, 128>}, {transform_indices = @transform_11, window_bounds = array<i64: 1, 128, 384>}, {transform_indices = @transform_12, window_bounds = array<i64: 1, 1, 384>}, {transform_indices = @transform_13, window_bounds = array<i64: 1, 128, 128>}, {transform_indices = @transform_14, window_bounds = array<i64: 1, 1, 128>}, {transform_indices = @transform_15, window_bounds = array<i64: 1, 128, 128>}, {transform_indices = @transform_16, window_bounds = array<i64: 1, 1, 128>}, {pipeline_mode = #tpu.pipeline_mode<synchronous>, transform_indices = @transform_17, window_bounds = array<i64: 128, 128>}, {pipeline_mode = #tpu.pipeline_mode<synchronous>, transform_indices = @transform_18, window_bounds = array<i64: 256, 128>}]} {
    %c0_i32 = arith.constant 0 : i32
    %0 = arith.cmpi eq, %arg0, %c0_i32 : i32
    %1 = arith.extui %0 : i1 to i32
    %c0_i32_0 = arith.constant 0 : i32
    %2 = arith.cmpi ne, %1, %c0_i32_0 : i32
    scf.if %2 {
      %c0_61 = arith.constant 0 : index
      %c0_62 = arith.constant 0 : index
      %75 = vector.load %arg6[%c0_61, %c0_62] : memref<128x128xbf16, #tpu.memory_space<vmem>>, vector<128x128xbf16>
      %c0_63 = arith.constant 0 : index
      %c0_64 = arith.constant 0 : index
      %76 = vector.load %arg18[%c0_63, %c0_64] : memref<128x128xbf16, #tpu.memory_space<vmem>>, vector<128x128xbf16>
      tpu.vector_store %arg18[%c0_63, %c0_64], %75 {strides = array<i32>} : memref<128x128xbf16, #tpu.memory_space<vmem>>, vector<128x128xbf16>,
      %c0_65 = arith.constant 0 : index
      %c0_66 = arith.constant 0 : index
      %77 = vector.load %arg7[%c0_65, %c0_66] : memref<256x128xbf16, #tpu.memory_space<vmem>>, vector<256x128xbf16>
      %c0_67 = arith.constant 0 : index
      %c0_68 = arith.constant 0 : index
      %78 = vector.load %arg19[%c0_67, %c0_68] : memref<256x128xbf16, #tpu.memory_space<vmem>>, vector<256x128xbf16>
      tpu.vector_store %arg19[%c0_67, %c0_68], %77 {strides = array<i32>} : memref<256x128xbf16, #tpu.memory_space<vmem>>, vector<256x128xbf16>,
    } else {
    }
    %c0 = arith.constant 0 : index
    %c0_1 = arith.constant 0 : index
    %3 = vector.load %arg18[%c0, %c0_1] : memref<128x128xbf16, #tpu.memory_space<vmem>>, vector<128x128xbf16>
    %c0_2 = arith.constant 0 : index
    %c0_3 = arith.constant 0 : index
    %4 = vector.load %arg19[%c0_2, %c0_3] : memref<256x128xbf16, #tpu.memory_space<vmem>>, vector<256x128xbf16>
    %c0_4 = arith.constant 0 : index
    %c0_5 = arith.constant 0 : index
    %5 = vector.load %arg1[%c0_4, %c0_5] : memref<256x128xbf16, #tpu.memory_space<vmem>>, vector<256x128xbf16>
    %cst = arith.constant dense<0.000000e+00> : vector<256x128xf32>
    %6 = tpu.matmul %5, %3, %cst {dimension_numbers = #tpu.dot_dimension_numbers<[1], [0], [0], [1], [0, 0, 1, 1], [], []>} : vector<256x128xbf16>, vector<128x128xbf16>, vector<256x128xf32> -> vector<256x128xf32>
    %7 = arith.truncf %6 : vector<256x128xf32> to vector<256x128xbf16>
    %c0_6 = arith.constant 0 : index
    %c0_7 = arith.constant 0 : index
    %8 = vector.load %arg2[%c0_6, %c0_7] : memref<256x128xbf16, #tpu.memory_space<vmem>>, vector<256x128xbf16>
    %cst_8 = arith.constant dense<0.000000e+00> : vector<256x128xf32>
    %9 = tpu.matmul %8, %3, %cst_8 {dimension_numbers = #tpu.dot_dimension_numbers<[1], [0], [0], [1], [0, 0, 1, 1], [], []>} : vector<256x128xbf16>, vector<128x128xbf16>, vector<256x128xf32> -> vector<256x128xf32>
    %10 = arith.truncf %9 : vector<256x128xf32> to vector<256x128xbf16>
    %c0_9 = arith.constant 0 : index
    %c0_10 = arith.constant 0 : index
    %c0_11 = arith.constant 0 : index
    %11 = vector.load %arg8[%c0_9, %c0_10, %c0_11] : memref<1x128x128xbf16, #tpu.memory_space<vmem>>, vector<1x128x128xbf16>
    %12 = vector.shape_cast %11 : vector<1x128x128xbf16> to vector<128x128xbf16>
    %cst_12 = arith.constant dense<0.000000e+00> : vector<256x128xf32>
    %13 = tpu.matmul %7, %12, %cst_12 {dimension_numbers = #tpu.dot_dimension_numbers<[1], [0], [0], [1], [0, 0, 1, 1], [], []>} : vector<256x128xbf16>, vector<128x128xbf16>, vector<256x128xf32> -> vector<256x128xf32>
    %c0_13 = arith.constant 0 : index
    %c0_14 = arith.constant 0 : index
    %c0_15 = arith.constant 0 : index
    %14 = vector.load %arg9[%c0_13, %c0_14, %c0_15] : memref<1x128x128xbf16, #tpu.memory_space<vmem>>, vector<1x128x128xbf16>
    %15 = vector.shape_cast %14 : vector<1x128x128xbf16> to vector<128x128xbf16>
    %cst_16 = arith.constant dense<0.000000e+00> : vector<256x128xf32>
    %16 = tpu.matmul %4, %15, %cst_16 {dimension_numbers = #tpu.dot_dimension_numbers<[1], [0], [0], [1], [0, 0, 1, 1], [], []>} : vector<256x128xbf16>, vector<128x128xbf16>, vector<256x128xf32> -> vector<256x128xf32>
    %17 = arith.addf %13, %16 : vector<256x128xf32>
    %c0_17 = arith.constant 0 : index
    %c0_18 = arith.constant 0 : index
    %c0_19 = arith.constant 0 : index
    %18 = vector.load %arg10[%c0_17, %c0_18, %c0_19] : memref<1x128x128xbf16, #tpu.memory_space<vmem>>, vector<1x128x128xbf16>
    %19 = vector.shape_cast %18 : vector<1x128x128xbf16> to vector<128x128xbf16>
    %cst_20 = arith.constant dense<0.000000e+00> : vector<256x128xf32>
    %20 = tpu.matmul %10, %19, %cst_20 {dimension_numbers = #tpu.dot_dimension_numbers<[1], [0], [0], [1], [0, 0, 1, 1], [], []>} : vector<256x128xbf16>, vector<128x128xbf16>, vector<256x128xf32> -> vector<256x128xf32>
    %21 = arith.addf %17, %20 : vector<256x128xf32>
    %c0_21 = arith.constant 0 : index
    %c0_22 = arith.constant 0 : index
    %c0_23 = arith.constant 0 : index
    %22 = vector.load %arg11[%c0_21, %c0_22, %c0_23] : memref<1x1x128xf32, #tpu.memory_space<vmem>>, vector<1x1x128xf32>
    %23 = vector.shape_cast %22 : vector<1x1x128xf32> to vector<1x128xf32>
    %24 = vector.broadcast %23 : vector<1x128xf32> to vector<256x128xf32>
    %25 = arith.addf %21, %24 : vector<256x128xf32>
    %cst_24 = arith.constant 0.000000e+00 : f32
    %26 = vector.broadcast %cst_24 : f32 to vector<256x128xf32>
    %27 = arith.maximumf %25, %26 : vector<256x128xf32>
    %28 = arith.truncf %27 : vector<256x128xf32> to vector<256x128xbf16>
    %c0_25 = arith.constant 0 : index
    %c0_26 = arith.constant 0 : index
    %c0_27 = arith.constant 0 : index
    %29 = vector.load %arg12[%c0_25, %c0_26, %c0_27] : memref<1x128x384xbf16, #tpu.memory_space<vmem>>, vector<1x128x384xbf16>
    %30 = vector.shape_cast %29 : vector<1x128x384xbf16> to vector<128x384xbf16>
    %cst_28 = arith.constant dense<0.000000e+00> : vector<256x384xf32>
    %31 = tpu.matmul %28, %30, %cst_28 {dimension_numbers = #tpu.dot_dimension_numbers<[1], [0], [0], [1], [0, 0, 1, 1], [], []>} : vector<256x128xbf16>, vector<128x384xbf16>, vector<256x384xf32> -> vector<256x384xf32>
    %c0_29 = arith.constant 0 : index
    %c0_30 = arith.constant 0 : index
    %c0_31 = arith.constant 0 : index
    %32 = vector.load %arg13[%c0_29, %c0_30, %c0_31] : memref<1x1x384xf32, #tpu.memory_space<vmem>>, vector<1x1x384xf32>
    %33 = vector.shape_cast %32 : vector<1x1x384xf32> to vector<1x384xf32>
    %34 = vector.broadcast %33 : vector<1x384xf32> to vector<256x384xf32>
    %35 = arith.addf %31, %34 : vector<256x384xf32>
    %cst_32 = arith.constant 0.000000e+00 : f32
    %36 = vector.broadcast %cst_32 : f32 to vector<256x384xf32>
    %37 = arith.maximumf %35, %36 : vector<256x384xf32>
    %38 = vector.extract_strided_slice %37 {offsets = [0, 0], sizes = [256, 128], strides = [1, 1]} : vector<256x384xf32> to vector<256x128xf32>
    %39 = arith.truncf %38 : vector<256x128xf32> to vector<256x128xbf16>
    %40 = vector.extract_strided_slice %37 {offsets = [0, 128], sizes = [256, 128], strides = [1, 1]} : vector<256x384xf32> to vector<256x128xf32>
    %41 = arith.truncf %40 : vector<256x128xf32> to vector<256x128xbf16>
    %42 = vector.extract_strided_slice %37 {offsets = [0, 256], sizes = [256, 128], strides = [1, 1]} : vector<256x384xf32> to vector<256x128xf32>
    %43 = arith.truncf %42 : vector<256x128xf32> to vector<256x128xbf16>
    %c0_33 = arith.constant 0 : index
    %c0_34 = arith.constant 0 : index
    %44 = vector.load %arg3[%c0_33, %c0_34] : memref<128x256xbf16, #tpu.memory_space<vmem>>, vector<128x256xbf16>
    %cst_35 = arith.constant dense<0.000000e+00> : vector<128x128xf32>
    %45 = tpu.matmul %44, %39, %cst_35 {dimension_numbers = #tpu.dot_dimension_numbers<[1], [0], [0], [1], [0, 0, 1, 1], [], []>} : vector<128x256xbf16>, vector<256x128xbf16>, vector<128x128xf32> -> vector<128x128xf32>
    %c0_36 = arith.constant 0 : index
    %c0_37 = arith.constant 0 : index
    %46 = vector.load %arg4[%c0_36, %c0_37] : memref<128x256xbf16, #tpu.memory_space<vmem>>, vector<128x256xbf16>
    %cst_38 = arith.constant dense<0.000000e+00> : vector<128x128xf32>
    %47 = tpu.matmul %46, %43, %cst_38 {dimension_numbers = #tpu.dot_dimension_numbers<[1], [0], [0], [1], [0, 0, 1, 1], [], []>} : vector<128x256xbf16>, vector<256x128xbf16>, vector<128x128xf32> -> vector<128x128xf32>
    %48 = arith.addf %45, %47 : vector<128x128xf32>
    %c0_39 = arith.constant 0 : index
    %c0_40 = arith.constant 0 : index
    %49 = vector.load %arg5[%c0_39, %c0_40] : memref<128x1xf32, #tpu.memory_space<vmem>>, vector<128x1xf32>
    %50 = vector.broadcast %49 : vector<128x1xf32> to vector<128x128xf32>
    %51 = arith.mulf %48, %50 : vector<128x128xf32>
    %52 = arith.truncf %51 : vector<128x128xf32> to vector<128x128xbf16>
    %c0_41 = arith.constant 0 : index
    %c0_42 = arith.constant 0 : index
    %c0_43 = arith.constant 0 : index
    %53 = vector.load %arg14[%c0_41, %c0_42, %c0_43] : memref<1x128x128xbf16, #tpu.memory_space<vmem>>, vector<1x128x128xbf16>
    %54 = vector.shape_cast %53 : vector<1x128x128xbf16> to vector<128x128xbf16>
    %cst_44 = arith.constant dense<0.000000e+00> : vector<128x128xf32>
    %55 = tpu.matmul %52, %54, %cst_44 {dimension_numbers = #tpu.dot_dimension_numbers<[1], [0], [0], [1], [0, 0, 1, 1], [], []>} : vector<128x128xbf16>, vector<128x128xbf16>, vector<128x128xf32> -> vector<128x128xf32>
    %c0_45 = arith.constant 0 : index
    %c0_46 = arith.constant 0 : index
    %c0_47 = arith.constant 0 : index
    %56 = vector.load %arg15[%c0_45, %c0_46, %c0_47] : memref<1x1x128xf32, #tpu.memory_space<vmem>>, vector<1x1x128xf32>
    %57 = vector.shape_cast %56 : vector<1x1x128xf32> to vector<1x128xf32>
    %58 = vector.broadcast %57 : vector<1x128xf32> to vector<128x128xf32>
    %59 = arith.addf %55, %58 : vector<128x128xf32>
    %cst_48 = arith.constant 0.000000e+00 : f32
    %60 = vector.broadcast %cst_48 : f32 to vector<128x128xf32>
    %61 = arith.maximumf %59, %60 : vector<128x128xf32>
    %62 = arith.truncf %61 : vector<128x128xf32> to vector<128x128xbf16>
    %c0_49 = arith.constant 0 : index
    %c0_50 = arith.constant 0 : index
    %c0_51 = arith.constant 0 : index
    %63 = vector.load %arg16[%c0_49, %c0_50, %c0_51] : memref<1x128x128xbf16, #tpu.memory_space<vmem>>, vector<1x128x128xbf16>
    %64 = vector.shape_cast %63 : vector<1x128x128xbf16> to vector<128x128xbf16>
    %cst_52 = arith.constant dense<0.000000e+00> : vector<128x128xf32>
    %65 = tpu.matmul %62, %64, %cst_52 {dimension_numbers = #tpu.dot_dimension_numbers<[1], [0], [0], [1], [0, 0, 1, 1], [], []>} : vector<128x128xbf16>, vector<128x128xbf16>, vector<128x128xf32> -> vector<128x128xf32>
    %c0_53 = arith.constant 0 : index
    %c0_54 = arith.constant 0 : index
    %c0_55 = arith.constant 0 : index
    %66 = vector.load %arg17[%c0_53, %c0_54, %c0_55] : memref<1x1x128xf32, #tpu.memory_space<vmem>>, vector<1x1x128xf32>
    %67 = vector.shape_cast %66 : vector<1x1x128xf32> to vector<1x128xf32>
    %68 = vector.broadcast %67 : vector<1x128xf32> to vector<128x128xf32>
    %69 = arith.addf %65, %68 : vector<128x128xf32>
    %cst_56 = arith.constant 0.000000e+00 : f32
    %70 = vector.broadcast %cst_56 : f32 to vector<128x128xf32>
    %71 = arith.maximumf %69, %70 : vector<128x128xf32>
    %72 = arith.truncf %71 : vector<128x128xf32> to vector<128x128xbf16>
    %c0_57 = arith.constant 0 : index
    %c0_58 = arith.constant 0 : index
    %73 = vector.load %arg18[%c0_57, %c0_58] : memref<128x128xbf16, #tpu.memory_space<vmem>>, vector<128x128xbf16>
    tpu.vector_store %arg18[%c0_57, %c0_58], %72 {strides = array<i32>} : memref<128x128xbf16, #tpu.memory_space<vmem>>, vector<128x128xbf16>,
    %c0_59 = arith.constant 0 : index
    %c0_60 = arith.constant 0 : index
    %74 = vector.load %arg19[%c0_59, %c0_60] : memref<256x128xbf16, #tpu.memory_space<vmem>>, vector<256x128xbf16>
    tpu.vector_store %arg19[%c0_59, %c0_60], %41 {strides = array<i32>} : memref<256x128xbf16, #tpu.memory_space<vmem>>, vector<256x128xbf16>,
    return
  }
  func.func @transform_0(%arg0: i32) -> (i32, i32) {
    %c0_i32 = arith.constant 0 : i32
    %c0_i32_0 = arith.constant 0 : i32
    %c0_i32_1 = arith.constant 0 : i32
    return %c0_i32, %c0_i32_0 : i32, i32
  }
  func.func @transform_1(%arg0: i32) -> (i32, i32) {
    %c0_i32 = arith.constant 0 : i32
    %c0_i32_0 = arith.constant 0 : i32
    %c0_i32_1 = arith.constant 0 : i32
    return %c0_i32, %c0_i32_0 : i32, i32
  }
  func.func @transform_2(%arg0: i32) -> (i32, i32) {
    %c0_i32 = arith.constant 0 : i32
    %c0_i32_0 = arith.constant 0 : i32
    %c0_i32_1 = arith.constant 0 : i32
    return %c0_i32, %c0_i32_0 : i32, i32
  }
  func.func @transform_3(%arg0: i32) -> (i32, i32) {
    %c0_i32 = arith.constant 0 : i32
    %c0_i32_0 = arith.constant 0 : i32
    %c0_i32_1 = arith.constant 0 : i32
    return %c0_i32, %c0_i32_0 : i32, i32
  }
  func.func @transform_4(%arg0: i32) -> (i32, i32) {
    %c0_i32 = arith.constant 0 : i32
    %c0_i32_0 = arith.constant 0 : i32
    %c0_i32_1 = arith.constant 0 : i32
    return %c0_i32, %c0_i32_0 : i32, i32
  }
  func.func @transform_5(%arg0: i32) -> (i32, i32) {
    %c0_i32 = arith.constant 0 : i32
    %c0_i32_0 = arith.constant 0 : i32
    %c0_i32_1 = arith.constant 0 : i32
    return %c0_i32, %c0_i32_0 : i32, i32
  }
  func.func @transform_6(%arg0: i32) -> (i32, i32) {
    %c0_i32 = arith.constant 0 : i32
    %c0_i32_0 = arith.constant 0 : i32
    %c0_i32_1 = arith.constant 0 : i32
    return %c0_i32, %c0_i32_0 : i32, i32
  }
  func.func @transform_7(%arg0: i32) -> (i32, i32, i32) {
    %c0_i32 = arith.constant 0 : i32
    %c0_i32_0 = arith.constant 0 : i32
    %c0_i32_1 = arith.constant 0 : i32
    return %arg0, %c0_i32, %c0_i32_0 : i32, i32, i32
  }
  func.func @transform_8(%arg0: i32) -> (i32, i32, i32) {
    %c0_i32 = arith.constant 0 : i32
    %c0_i32_0 = arith.constant 0 : i32
    %c0_i32_1 = arith.constant 0 : i32
    return %arg0, %c0_i32, %c0_i32_0 : i32, i32, i32
  }
  func.func @transform_9(%arg0: i32) -> (i32, i32, i32) {
    %c0_i32 = arith.constant 0 : i32
    %c0_i32_0 = arith.constant 0 : i32
    %c0_i32_1 = arith.constant 0 : i32
    return %arg0, %c0_i32, %c0_i32_0 : i32, i32, i32
  }
  func.func @transform_10(%arg0: i32) -> (i32, i32, i32) {
    %c0_i32 = arith.constant 0 : i32
    %c0_i32_0 = arith.constant 0 : i32
    %c0_i32_1 = arith.constant 0 : i32
    return %arg0, %c0_i32, %c0_i32_0 : i32, i32, i32
  }
  func.func @transform_11(%arg0: i32) -> (i32, i32, i32) {
    %c0_i32 = arith.constant 0 : i32
    %c0_i32_0 = arith.constant 0 : i32
    %c0_i32_1 = arith.constant 0 : i32
    return %arg0, %c0_i32, %c0_i32_0 : i32, i32, i32
  }
  func.func @transform_12(%arg0: i32) -> (i32, i32, i32) {
    %c0_i32 = arith.constant 0 : i32
    %c0_i32_0 = arith.constant 0 : i32
    %c0_i32_1 = arith.constant 0 : i32
    return %arg0, %c0_i32, %c0_i32_0 : i32, i32, i32
  }
  func.func @transform_13(%arg0: i32) -> (i32, i32, i32) {
    %c0_i32 = arith.constant 0 : i32
    %c0_i32_0 = arith.constant 0 : i32
    %c0_i32_1 = arith.constant 0 : i32
    return %arg0, %c0_i32, %c0_i32_0 : i32, i32, i32
  }
  func.func @transform_14(%arg0: i32) -> (i32, i32, i32) {
    %c0_i32 = arith.constant 0 : i32
    %c0_i32_0 = arith.constant 0 : i32
    %c0_i32_1 = arith.constant 0 : i32
    return %arg0, %c0_i32, %c0_i32_0 : i32, i32, i32
  }
  func.func @transform_15(%arg0: i32) -> (i32, i32, i32) {
    %c0_i32 = arith.constant 0 : i32
    %c0_i32_0 = arith.constant 0 : i32
    %c0_i32_1 = arith.constant 0 : i32
    return %arg0, %c0_i32, %c0_i32_0 : i32, i32, i32
  }
  func.func @transform_16(%arg0: i32) -> (i32, i32, i32) {
    %c0_i32 = arith.constant 0 : i32
    %c0_i32_0 = arith.constant 0 : i32
    %c0_i32_1 = arith.constant 0 : i32
    return %arg0, %c0_i32, %c0_i32_0 : i32, i32, i32
  }
  func.func @transform_17(%arg0: i32) -> (i32, i32) {
    %c0_i32 = arith.constant 0 : i32
    %c0_i32_0 = arith.constant 0 : i32
    %c0_i32_1 = arith.constant 0 : i32
    return %c0_i32, %c0_i32_0 : i32, i32
  }
  func.func @transform_18(%arg0: i32) -> (i32, i32) {
    %c0_i32 = arith.constant 0 : i32
    %c0_i32_0 = arith.constant 0 : i32
    %c0_i32_1 = arith.constant 0 : i32
    return %c0_i32, %c0_i32_0 : i32, i32
  }
}

</mosaic_0001>

<bundles_post_ra>
// kernel: graph_triple_conv_net.1
= control target key start
LH: loop header
LB: loop body
LE: loop exit
PB: predicated region body
PF: predicated region fallthrough
CT: control target
= control target key end

     0   :  { %s6753_s0 = inlined_call_operand.vmem [shape: bf16[256,128], index: 0, kind: input, shape index: {}]   ;;  %s6754_s1 = inlined_call_operand.vmem [shape: bf16[256,128], index: 1, kind: input, shape index: {}]   ;;  %s6755_s2 = inlined_call_operand.vmem [shape: bf16[128,256], index: 2, kind: input, shape index: {}]   ;;  %s6756_s3 = inlined_call_operand.vmem [shape: bf16[128,256], index: 3, kind: input, shape index: {}]   ;;  %s6757_s4 = inlined_call_operand.vmem [shape: f32[128,1], index: 4, kind: input, shape index: {}]   ;;  %s6758_s5 = inlined_call_operand.vmem [shape: bf16[128,128], index: 5, kind: input, shape index: {}]   ;;  %s6759_s6 = inlined_call_operand.vmem [shape: bf16[256,128], index: 6, kind: input, shape index: {}]   ;;  %s6760_s7 = inlined_call_operand.vmem [shape: bf16[2,128,128], index: 7, kind: input, shape index: {}]   ;;  %s6761_s8 = inlined_call_operand.vmem [shape: bf16[2,128,128], index: 8, kind: input, shape index: {}]   ;;  %s6762_s9 = inlined_call_operand.vmem [shape: bf16[2,128,128], index: 9, kind: input, shape index: {}]   ;;  %s6763_s10 = inlined_call_operand.vmem [shape: f32[2,1,128], index: 10, kind: input, shape index: {}]   ;;  %s6764_s11 = inlined_call_operand.vmem [shape: bf16[2,128,384], index: 11, kind: input, shape index: {}]   ;;  %s6765_s12 = inlined_call_operand.vmem [shape: f32[2,1,384], index: 12, kind: input, shape index: {}]   ;;  %s6766_s13 = inlined_call_operand.vmem [shape: bf16[2,128,128], index: 13, kind: input, shape index: {}]   ;;  %s6767_s14 = inlined_call_operand.vmem [shape: f32[2,1,128], index: 14, kind: input, shape index: {}]   ;;  %s6768_s15 = inlined_call_operand.vmem [shape: bf16[2,128,128], index: 15, kind: input, shape index: {}]   ;;  %s6769_s16 = inlined_call_operand.vmem [shape: f32[2,1,128], index: 16, kind: input, shape index: {}]   ;;  %s6770_s17 = inlined_call_operand.vmem [shape: bf16[128,128], index: 17, kind: output, shape index: {0}]   ;;  %s6771_s18 = inlined_call_operand.hbm [shape: bf16[256,128], index: 18, kind: output, shape index: {1}]  }
   0x1   :  { %6779 = sst [smem:[#allocation6_spill]] %s6753_s0 }
   0x2   :  { %6780 = sst [smem:[#allocation7_spill]] %s6754_s1 }
   0x3   :  { %6781 = sst [smem:[#allocation8_spill]] %s6755_s2 }
   0x4   :  { %6782 = sst [smem:[#allocation9_spill]] %s6756_s3 }
   0x5   :  { %6783 = sst [smem:[#allocation10_spill]] %s6757_s4 }
   0x6   :  { %6784 = sst [smem:[#allocation11_spill]] %s6760_s7 }
   0x7   :  { %6785 = sst [smem:[#allocation12_spill]] %s6761_s8 }
   0x8   :  { %6786 = sst [smem:[#allocation13_spill]] %s6762_s9 }
   0x9   :  { %6787 = sst [smem:[#allocation14_spill]] %s6763_s10 }
   0xa   :  { %6788 = sst [smem:[#allocation15_spill]] %s6766_s13 }
   0xb   :  { %6789 = sst [smem:[#allocation16_spill]] %s6771_s18 }
   0xc   :  { %24 = vsyncpa [#allocation3], 0  ;;  %s5823_s27 = smov 0  }
   0xd LB: > { %6790 = sst [smem:[#allocation5_spill]] %s5722_s27  ;;  %s5829_s28 = sadd.s32 4294967295, %s5722_s27   ;;  %s5722_s27 = sphi %s5823_s27, %s30_s27  }
   0xe   : > { %p4353_p0 = scmp.ge.s32.totalorder %s5722_s27, 1  ;;  %p589_p1 = scmp.lt.s32.totalorder %s5722_s27, 3 }
  0x10   : > { %p590_p2 = pnand %p4353_p0, %p589_p1 }
  0x11   : > { %p676_p3 = scmp.lt.s32.totalorder (!%p590_p2), %s5829_s28, 1  ;;  %s6792_s7 = sld [smem:[#allocation11_spill]] (!%p590_p2) }
  0x12   : > { %593 = sbr.rel (%p590_p2) target bundleno = 1714 (0x6b2), region = 88  ;;  %s6793_s8 = sld [smem:[#allocation12_spill]] (!%p590_p2) }
  0x13   : > { %s6794_s9 = sld [smem:[#allocation13_spill]] (!%p590_p2)  ;;  %s6795_s13 = sld [smem:[#allocation15_spill]] (!%p590_p2) }
  0x14   : > { %p4365_p4 = scmp.ne.s32.totalorder (!%p590_p2), %s5829_s28, 0 }
  0x19   : > { %s5835_s29 = scalar_select %p676_p3, %s5829_s28, 1 }
  0x1a   : > { %723 = sbr.rel (%p4365_p4) target bundleno = 39 (0x27), region = 92  ;;  %v724_v0 = vld [vmem:[%s6758_s5] sm:$0xff] (!%p4365_p4)   ;;  %v726_v1 = vld [vmem:[%s6758_s5 + $0x8] sm:$0xff] (!%p4365_p4)   ;;  %v728_v2 = vld [vmem:[%s6758_s5 + $0x10] sm:$0xff] (!%p4365_p4)  }
  0x1b   : > { %s4573_s30 = sshll.u32 %s5835_s29, 6  ;;  %s5488_s18 = smul.u32 192, %s5835_s29  ;;  %740 = vst [vmem:[%s6770_s17] sm:$0xff] (!%p4365_p4), %v724_v0   ;;  %742 = vst [vmem:[%s6770_s17 + $0x8] sm:$0xff] (!%p4365_p4), %v726_v1   ;;  %v730_v3 = vld [vmem:[%s6758_s5 + $0x18] sm:$0xff] (!%p4365_p4)   ;;  %v732_v4 = vld [vmem:[%s6758_s5 + $0x20] sm:$0xff] (!%p4365_p4)  }
  0x1c   : > { %s5845_s22 = scalar_lea.vmem %s6792_s7, %s4573_s30  ;;  %s5850_s24 = scalar_lea.vmem %s6793_s8, %s4573_s30  ;;  %744 = vst [vmem:[%s6770_s17 + $0x10] sm:$0xff] (!%p4365_p4), %v728_v2   ;;  %v734_v5 = vld [vmem:[%s6758_s5 + $0x28] sm:$0xff] (!%p4365_p4)   ;;  %746 = vst [vmem:[%s6770_s17 + $0x18] sm:$0xff] (!%p4365_p4), %v730_v3   ;;  %v736_v6 = vld [vmem:[%s6758_s5 + $0x30] sm:$0xff] (!%p4365_p4)  }
  0x1d   : > { %s5855_s27 = scalar_lea.vmem %s6794_s9, %s4573_s30  ;;  %s5489_s4 = smul.u32 3, %s5835_s29  ;;  %748 = vst [vmem:[%s6770_s17 + $0x20] sm:$0xff] (!%p4365_p4), %v732_v4   ;;  %750 = vst [vmem:[%s6770_s17 + $0x28] sm:$0xff] (!%p4365_p4), %v734_v5   ;;  %v738_v7 = vld [vmem:[%s6758_s5 + $0x38] sm:$0xff] (!%p4365_p4)   ;;  %v756_v8 = vld [vmem:[%s6759_s6] sm:$0xff] (!%p4365_p4)  }
  0x1e   : > { %s5862_s19 = scalar_lea.vmem %s6795_s13, %s4573_s30  ;;  %s5867_s1 = scalar_lea.vmem %s6764_s11, %s5488_s18  ;;  %752 = vst [vmem:[%s6770_s17 + $0x30] sm:$0xff] (!%p4365_p4), %v736_v6   ;;  %754 = vst [vmem:[%s6770_s17 + $0x38] sm:$0xff] (!%p4365_p4), %v738_v7   ;;  %v758_v9 = vld [vmem:[%s6759_s6 + $0x8] sm:$0xff] (!%p4365_p4)   ;;  %v760_v10 = vld [vmem:[%s6759_s6 + $0x10] sm:$0xff] (!%p4365_p4)  }
  0x1f   : > { %s710_s7 = scalar_lea.vmem %s6767_s14, %s5835_s29  ;;  %s5876_s26 = scalar_lea.vmem %s6765_s12, %s5489_s4  ;;  %788 = vst [vmem:[#allocation2] sm:$0xff] (!%p4365_p4), %v756_v8   ;;  %v762_v11 = vld [vmem:[%s6759_s6 + $0x18] sm:$0xff] (!%p4365_p4)   ;;  %790 = vst [vmem:[#allocation2 + $0x8] sm:$0xff] (!%p4365_p4), %v758_v9   ;;  %v764_v12 = vld [vmem:[%s6759_s6 + $0x20] sm:$0xff] (!%p4365_p4)  }
  0x20   : > { %s5881_s3 = scalar_lea.vmem %s6768_s15, %s4573_s30  ;;  %s718_s20 = scalar_lea.vmem %s6769_s16, %s5835_s29  ;;  %792 = vst [vmem:[#allocation2 + $0x10] sm:$0xff] (!%p4365_p4), %v760_v10   ;;  %794 = vst [vmem:[#allocation2 + $0x18] sm:$0xff] (!%p4365_p4), %v762_v11   ;;  %v766_v13 = vld [vmem:[%s6759_s6 + $0x28] sm:$0xff] (!%p4365_p4)   ;;  %v768_v14 = vld [vmem:[%s6759_s6 + $0x30] sm:$0xff] (!%p4365_p4)  }
  0x21   : > { %796 = vst [vmem:[#allocation2 + $0x20] sm:$0xff] %v764_v12   ;;  %798 = vst [vmem:[#allocation2 + $0x28] sm:$0xff] %v766_v13   ;;  %v770_v15 = vld [vmem:[%s6759_s6 + $0x38] sm:$0xff]   ;;  %v772_v16 = vld [vmem:[%s6759_s6 + $0x40] sm:$0xff]  }
  0x22   : > { %800 = vst [vmem:[#allocation2 + $0x30] sm:$0xff] %v768_v14   ;;  %v774_v17 = vld [vmem:[%s6759_s6 + $0x48] sm:$0xff]   ;;  %802 = vst [vmem:[#allocation2 + $0x38] sm:$0xff] %v770_v15   ;;  %v776_v18 = vld [vmem:[%s6759_s6 + $0x50] sm:$0xff]  }
  0x23   : > { %804 = vst [vmem:[#allocation2 + $0x40] sm:$0xff] %v772_v16   ;;  %806 = vst [vmem:[#allocation2 + $0x48] sm:$0xff] %v774_v17   ;;  %v778_v19 = vld [vmem:[%s6759_s6 + $0x58] sm:$0xff]   ;;  %v780_v20 = vld [vmem:[%s6759_s6 + $0x60] sm:$0xff]  }
  0x24   : > { %808 = vst [vmem:[#allocation2 + $0x50] sm:$0xff] %v776_v18   ;;  %810 = vst [vmem:[#allocation2 + $0x58] sm:$0xff] %v778_v19   ;;  %v782_v21 = vld [vmem:[%s6759_s6 + $0x68] sm:$0xff]   ;;  %v784_v22 = vld [vmem:[%s6759_s6 + $0x70] sm:$0xff]  }
  0x25   : > { %812 = vst [vmem:[#allocation2 + $0x60] sm:$0xff] %v780_v20   ;;  %v786_v23 = vld [vmem:[%s6759_s6 + $0x78] sm:$0xff]   ;;  %814 = vst [vmem:[#allocation2 + $0x68] sm:$0xff] %v782_v21  }
  0x26   : > { %816 = vst [vmem:[#allocation2 + $0x70] sm:$0xff] %v784_v22   ;;  %818 = vst [vmem:[#allocation2 + $0x78] sm:$0xff] %v786_v23  }
  0x27 PF: > { %s6796_s2 = sld [smem:[#allocation6_spill]]  ;;  %s6797_s21 = sld [smem:[#allocation7_spill]]  ;;  %v5550_v42 = vld [vmem:[%s5850_s24] sm:$0xff]   ;;  %v5551_v43 = vld [vmem:[%s5850_s24 + $0x8] sm:$0xff]   ;;  %v5552_v48 = vld [vmem:[%s5850_s24 + $0x10] sm:$0xff]  }
  0x28   : > { %v5510_v24 = vld [vmem:[%s6770_s17] sm:$0xff]   ;;  %v5511_v25 = vld [vmem:[%s6770_s17 + $0x8] sm:$0xff]   ;;  %v5553_v49 = vld [vmem:[%s5850_s24 + $0x18] sm:$0xff]   ;;  %s6798_s0 = sld [smem:[#allocation14_spill]]  ;;  %s6800_s8 = sld [smem:[#allocation8_spill]] }
  0x29   : > { %5072 = vmatprep.subr.bf16.mxu0 %v5510_v24  ;;  %5120 = vmatprep.subr.bf16.mxu1 %v5510_v24  ;;  %v5512_v26 = vld [vmem:[%s6770_s17 + $0x10] sm:$0xff]   ;;  %v5513_v27 = vld [vmem:[%s6770_s17 + $0x18] sm:$0xff]   ;;  %v5554_v54 = vld [vmem:[%s5850_s24 + $0x20] sm:$0xff]   ;;  %s6801_s9 = sld [smem:[#allocation9_spill]]  ;;  %p5494_p5 = scmp.eq.s32.totalorder %s5829_s28, 1 }
  0x2a   : > { %5073 = vmatpush3.bf16.msra.mxu0 %v5510_v24  ;;  %5121 = vmatpush3.bf16.msra.mxu1 %v5510_v24  ;;  %v5514_v29 = vld [vmem:[%s6770_s17 + $0x20] sm:$0xff]   ;;  %v5515_v30 = vld [vmem:[%s6770_s17 + $0x28] sm:$0xff]   ;;  %v5556_v60 = vld [vmem:[%s5850_s24 + $0x30] sm:$0xff]  }
  0x2b   : > { %5074 = vmatprep.subr.bf16.mxu0 %v5511_v25  ;;  %5122 = vmatprep.subr.bf16.mxu1 %v5511_v25  ;;  %v5516_v31 = vld [vmem:[%s6770_s17 + $0x30] sm:$0xff]   ;;  %v5517_v32 = vld [vmem:[%s6770_s17 + $0x38] sm:$0xff]   ;;  %v5555_v55 = vld [vmem:[%s5850_s24 + $0x28] sm:$0xff]  }
  0x2c   : > { %v5557_v61 = vld [vmem:[%s5850_s24 + $0x38] sm:$0xff]   ;;  %v5568_v2 = vld [vmem:[%s5845_s22] sm:$0xff]   ;;  %v5559_v10 = vld [vmem:[#allocation2 + $0x8] sm:$0xff]  }
  0x2d   : > { %v5518_v28 = vld [vmem:[%s6796_s2] sm:$0xff]   ;;  %v5519_v34 = vld [vmem:[%s6796_s2 + $0x8] sm:$0xff]   ;;  %v5520_v35 = vld [vmem:[%s6796_s2 + $0x10] sm:$0xff]  }
  0x2e   : > { %5075 = vmatpush3.bf16.msra.mxu0 %v5511_v25  ;;  %5123 = vmatpush3.bf16.msra.mxu1 %v5511_v25  ;;  %v5534_v33 = vld [vmem:[%s6797_s21] sm:$0xff]   ;;  %v5535_v36 = vld [vmem:[%s6797_s21 + $0x8] sm:$0xff]   ;;  %v5536_v37 = vld [vmem:[%s6797_s21 + $0x10] sm:$0xff]   ;;  %s6799_s18 = scalar_lea.vmem %s6798_s0, %s5835_s29 }
  0x2f   : > { %5076 = vmatprep.subr.bf16.mxu0 %v5512_v26  ;;  %5124 = vmatprep.subr.bf16.mxu1 %v5512_v26  ;;  %v5521_v38 = vld [vmem:[%s6796_s2 + $0x18] sm:$0xff]   ;;  %v5522_v39 = vld [vmem:[%s6796_s2 + $0x20] sm:$0xff]   ;;  %v5523_v44 = vld [vmem:[%s6796_s2 + $0x28] sm:$0xff]  }
  0x30   : > { %5088 = vmatprep.mubr.bf16.mxu0 %v5518_v28  ;;  %5136 = vmatprep.mubr.bf16.mxu1 %v5534_v33  ;;  %v5537_v40 = vld [vmem:[%s6797_s21 + $0x18] sm:$0xff]   ;;  %v5538_v41 = vld [vmem:[%s6797_s21 + $0x20] sm:$0xff]   ;;  %v5524_v45 = vld [vmem:[%s6796_s2 + $0x30] sm:$0xff]  }
  0x31   : > { %v5539_v46 = vld [vmem:[%s6797_s21 + $0x28] sm:$0xff]   ;;  %v5540_v47 = vld [vmem:[%s6797_s21 + $0x30] sm:$0xff]   ;;  %v5525_v50 = vld [vmem:[%s6796_s2 + $0x38] sm:$0xff]  }
  0x32   : > { %5077 = vmatpush3.bf16.msra.mxu0 %v5512_v26  ;;  %5125 = vmatpush3.bf16.msra.mxu1 %v5512_v26  ;;  %v5526_v51 = vld [vmem:[%s6796_s2 + $0x40] sm:$0xff]   ;;  %v5541_v52 = vld [vmem:[%s6797_s21 + $0x38] sm:$0xff]   ;;  %v5527_v56 = vld [vmem:[%s6796_s2 + $0x48] sm:$0xff]  }
  0x33   : > { %5078 = vmatprep.subr.bf16.mxu0 %v5513_v27  ;;  %5126 = vmatprep.subr.bf16.mxu1 %v5513_v27  ;;  %v5542_v53 = vld [vmem:[%s6797_s21 + $0x40] sm:$0xff]   ;;  %v5528_v57 = vld [vmem:[%s6796_s2 + $0x50] sm:$0xff]   ;;  %v5543_v58 = vld [vmem:[%s6797_s21 + $0x48] sm:$0xff]  }
  0x34   : > { %v5544_v59 = vld [vmem:[%s6797_s21 + $0x50] sm:$0xff]   ;;  %v5529_v62 = vld [vmem:[%s6796_s2 + $0x58] sm:$0xff]   ;;  %v5530_v0 = vld [vmem:[%s6796_s2 + $0x60] sm:$0xff]  }
  0x35   : > { %v5545_v63 = vld [vmem:[%s6797_s21 + $0x58] sm:$0xff]   ;;  %v5546_v1 = vld [vmem:[%s6797_s21 + $0x60] sm:$0xff]   ;;  %v5531_v3 = vld [vmem:[%s6796_s2 + $0x68] sm:$0xff]  }
  0x36   : > { %5079 = vmatpush3.bf16.msra.mxu0 %v5513_v27  ;;  %5127 = vmatpush3.bf16.msra.mxu1 %v5513_v27  ;;  %v5547_v4 = vld [vmem:[%s6797_s21 + $0x68] sm:$0xff]   ;;  %v5532_v5 = vld [vmem:[%s6796_s2 + $0x70] sm:$0xff]   ;;  %v5533_v7 = vld [vmem:[%s6796_s2 + $0x78] sm:$0xff]  }
  0x37   : > { %5080 = vmatprep.subr.bf16.mxu0 %v5514_v29  ;;  %5128 = vmatprep.subr.bf16.mxu1 %v5514_v29  ;;  %v5548_v6 = vld [vmem:[%s6797_s21 + $0x70] sm:$0xff]   ;;  %v5549_v8 = vld [vmem:[%s6797_s21 + $0x78] sm:$0xff]   ;;  %v5558_v9 = vld [vmem:[#allocation2] sm:$0xff]  }
  0x38   : > { %v5560_v11 = vld [vmem:[#allocation2 + $0x10] sm:$0xff]   ;;  %v5569_v12 = vld [vmem:[%s5845_s22 + $0x8] sm:$0xff]   ;;  %v5561_v14 = vld [vmem:[#allocation2 + $0x18] sm:$0xff]  }
  0x39   : > { %v5572_v13 = vld [vmem:[%s5845_s22 + $0x10] sm:$0xff]   ;;  %v5562_v15 = vld [vmem:[#allocation2 + $0x20] sm:$0xff]   ;;  %v5573_v16 = vld [vmem:[%s5845_s22 + $0x18] sm:$0xff]  }
  0x3a   : > { %5081 = vmatpush3.bf16.msra.mxu0 %v5514_v29  ;;  %5129 = vmatpush3.bf16.msra.mxu1 %v5514_v29  ;;  %v5576_v17 = vld [vmem:[%s5845_s22 + $0x20] sm:$0xff]   ;;  %v5563_v18 = vld [vmem:[#allocation2 + $0x28] sm:$0xff]   ;;  %v5564_v19 = vld [vmem:[#allocation2 + $0x30] sm:$0xff]  }
  0x3b   : > { %5082 = vmatprep.subr.bf16.mxu0 %v5515_v30  ;;  %5130 = vmatprep.subr.bf16.mxu1 %v5515_v30  ;;  %v5577_v20 = vld [vmem:[%s5845_s22 + $0x28] sm:$0xff]   ;;  %v5580_v21 = vld [vmem:[%s5845_s22 + $0x30] sm:$0xff]   ;;  %v5565_v22 = vld [vmem:[#allocation2 + $0x38] sm:$0xff]  }
  0x3c   : > { %v5566_v23 = vld [vmem:[#allocation2 + $0x40] sm:$0xff]   ;;  %v5581_v24 = vld [vmem:[%s5845_s22 + $0x38] sm:$0xff]   ;;  %v5567_v25 = vld [vmem:[#allocation2 + $0x48] sm:$0xff]   ;;  %s6802_s22 = sld [smem:[#allocation10_spill]] }
  0x3d   : > { %v5570_v26 = vld [vmem:[#allocation2 + $0x50] sm:$0xff]   ;;  %v5571_v27 = vld [vmem:[#allocation2 + $0x58] sm:$0xff]   ;;  %v5574_v28 = vld [vmem:[#allocation2 + $0x60] sm:$0xff]  }
  0x3e   : > { %5083 = vmatpush3.bf16.msra.mxu0 %v5515_v30  ;;  %5131 = vmatpush3.bf16.msra.mxu1 %v5515_v30  ;;  %v5575_v29 = vld [vmem:[#allocation2 + $0x68] sm:$0xff]   ;;  %v5578_v30 = vld [vmem:[#allocation2 + $0x70] sm:$0xff]  }
  0x3f   : > { %5084 = vmatprep.subr.bf16.mxu0 %v5516_v31  ;;  %5132 = vmatprep.subr.bf16.mxu1 %v5516_v31  ;;  %v5590_v33 = vld [vmem:[%s5867_s1] ss:$12 sps:$4 sm:$0xff]  }
  0x42   : > { %5085 = vmatpush3.bf16.msra.mxu0 %v5516_v31  ;;  %5133 = vmatpush3.bf16.msra.mxu1 %v5516_v31  ;;  %v5579_v31 = vld [vmem:[#allocation2 + $0x78] sm:$0xff]  }
  0x43   : > { %5086 = vmatprep.subr.bf16.mxu0 %v5517_v32  ;;  %5134 = vmatprep.subr.bf16.mxu1 %v5517_v32 }
  0x46   : > { %5087 = vmatpush3.bf16.msra.mxu0 %v5517_v32  ;;  %5135 = vmatpush3.bf16.msra.mxu1 %v5517_v32  ;;  %v5582_v32 = vld [vmem:[%s5855_s27] sm:$0xff]  }
  0x47   : > { %5168 = vmatprep.subr.bf16.mxu0 %v5550_v42 }
  0x49   : > { %5089 = vmatmul.mubr.bf16.vlgmr.msra.gmra.mrb[0].mxu0 %v5519_v34  ;;  %5137 = vmatmul.mubr.bf16.vlgmr.msra.gmra.mrb[0].mxu1 %v5535_v36  ;;  %v5592_v34 = vld [vmem:[%s5867_s1 + $0x4] ss:$12 sps:$4 sm:$0xff]  }
  0x4a   : > { %5092 = vmatprep.mubr.bf16.mxu0 %v5520_v35  ;;  %5140 = vmatprep.mubr.bf16.mxu1 %v5536_v37  ;;  %v5595_v37 = vld [vmem:[%s5867_s1 + $0x1c] ss:$12 sps:$4 sm:$0xff]  }
  0x4b   : > { %5169 = vmatpush3.bf16.msra.mxu0 %v5550_v42  ;;  %2593 = vmatprep.subr.bf16.mxu1 %v5592_v34  ;;  %v5593_v42 = vld [vmem:[%s5867_s1 + $0x18] ss:$12 sps:$4 sm:$0xff]  }
  0x4c   : > { %5170 = vmatprep.subr.bf16.mxu0 %v5551_v43  ;;  %2594 = vmatpush1.bf16.msra.mxu1 %v5590_v33 }
  0x4d   : > { %2595 = vmatprep.subr.bf16.mxu1 %v5595_v37 }
  0x4f   : > { %5171 = vmatpush3.bf16.msra.mxu0 %v5551_v43 }
  0x50   : > { %5172 = vmatprep.subr.bf16.mxu0 %v5552_v48  ;;  %2596 = vmatpush1.bf16.msra.mxu1 %v5593_v42 }
  0x51   : > { %5093 = vmatmul.mubr.bf16.gmra.mrb[4].mxu0 %v5521_v38  ;;  %5141 = vmatmul.mubr.bf16.gmra.mrb[4].mxu1 %v5537_v40 }
  0x52   : > { %5096 = vmatprep.mubr.bf16.mxu0 %v5522_v39  ;;  %5144 = vmatprep.mubr.bf16.mxu1 %v5538_v41 }
  0x53   : > { %5173 = vmatpush3.bf16.msra.mxu0 %v5552_v48 }
  0x54   : > { %5174 = vmatprep.subr.bf16.mxu0 %v5553_v49 }
  0x57   : > { %5175 = vmatpush3.bf16.msra.mxu0 %v5553_v49 }
  0x58   : > { %5176 = vmatprep.subr.bf16.mxu0 %v5554_v54 }
  0x59   : > { %5097 = vmatmul.mubr.bf16.gmra.mrb[8].mxu0 %v5523_v44  ;;  %5145 = vmatmul.mubr.bf16.gmra.mrb[8].mxu1 %v5539_v46 }
  0x5a   : > { %5100 = vmatprep.mubr.bf16.mxu0 %v5524_v45  ;;  %5148 = vmatprep.mubr.bf16.mxu1 %v5540_v47  ;;  %v5598_v47 = vld [vmem:[%s5867_s1 + $0x34] ss:$12 sps:$4 sm:$0xff]  }
  0x5b   : > { %5177 = vmatpush3.bf16.msra.mxu0 %v5554_v54  ;;  %2597 = vmatprep.subr.bf16.mxu1 %v5598_v47 }
  0x5c   : > { %5178 = vmatprep.subr.bf16.mxu0 %v5555_v55 }
  0x5f   : > { %5179 = vmatpush3.bf16.msra.mxu0 %v5555_v55 }
  0x60   : > { %5180 = vmatprep.subr.bf16.mxu0 %v5556_v60 }
  0x61   : > { %5101 = vmatmul.mubr.bf16.gmra.mrb[12].mxu0 %v5525_v50  ;;  %5149 = vmatmul.mubr.bf16.gmra.mrb[12].mxu1 %v5541_v52  ;;  %v5583_v50 = vld [vmem:[%s5855_s27 + $0x8] sm:$0xff]  }
  0x62   : > { %5104 = vmatprep.mubr.bf16.mxu0 %v5526_v51  ;;  %5152 = vmatprep.mubr.bf16.mxu1 %v5542_v53  ;;  %v5596_v51 = vld [vmem:[%s5867_s1 + $0x30] ss:$12 sps:$4 sm:$0xff]   ;;  %v5601_v52 = vld [vmem:[%s5867_s1 + $0x4c] ss:$12 sps:$4 sm:$0xff]  }
  0x63   : > { %5181 = vmatpush3.bf16.msra.mxu0 %v5556_v60  ;;  %2598 = vmatpush1.bf16.msra.mxu1 %v5596_v51  ;;  %v5599_v60 = vld [vmem:[%s5867_s1 + $0x48] ss:$12 sps:$4 sm:$0xff]  }
  0x64   : > { %5182 = vmatprep.subr.bf16.mxu0 %v5557_v61  ;;  %2599 = vmatprep.subr.bf16.mxu1 %v5601_v52 }
  0x67   : > { %5183 = vmatpush3.bf16.msra.mxu0 %v5557_v61  ;;  %2600 = vmatpush1.bf16.msra.mxu1 %v5599_v60 }
  0x68   : > { %5216 = vmatprep.subr.bf16.mxu0 %v5568_v2 }
  0x69   : > { %5105 = vmatmul.mubr.bf16.gmra.mrb[16].mxu0 %v5527_v56  ;;  %5153 = vmatmul.mubr.bf16.gmra.mrb[16].mxu1 %v5543_v58  ;;  %v5584_v56 = vld [vmem:[%s5855_s27 + $0x10] sm:$0xff]  }
  0x6a   : > { %5108 = vmatprep.mubr.bf16.mxu0 %v5528_v57  ;;  %5156 = vmatprep.mubr.bf16.mxu1 %v5544_v59 }
  0x71   : > { %5109 = vmatmul.mubr.bf16.gmra.mrb[20].mxu0 %v5529_v62  ;;  %5157 = vmatmul.mubr.bf16.gmra.mrb[20].mxu1 %v5545_v63 }
  0x72   : > { %5112 = vmatprep.mubr.bf16.mxu0 %v5530_v0  ;;  %5160 = vmatprep.mubr.bf16.mxu1 %v5546_v1  ;;  %v5604_v1 = vld [vmem:[%s5867_s1 + $0x64] ss:$12 sps:$4 sm:$0xff]  }
  0x73   : > { %2601 = vmatprep.subr.bf16.mxu1 %v5604_v1 }
  0x79   : > { %5113 = vmatmul.mubr.bf16.gmra.mrb[24].mxu0 %v5531_v3  ;;  %5161 = vmatmul.mubr.bf16.gmra.mrb[24].mxu1 %v5547_v4  ;;  %v5585_v4 = vld [vmem:[%s5855_s27 + $0x18] sm:$0xff]  }
  0x7a   : > { %5116 = vmatprep.mubr.bf16.mxu0 %v5532_v5  ;;  %5164 = vmatprep.mubr.bf16.mxu1 %v5548_v6  ;;  %v5602_v5 = vld [vmem:[%s5867_s1 + $0x60] ss:$12 sps:$4 sm:$0xff]   ;;  %v5607_v6 = vld [vmem:[%s5867_s1 + $0x7c] ss:$12 sps:$4 sm:$0xff]  }
  0x7b   : > { %2602 = vmatpush1.bf16.msra.mxu1 %v5602_v5 }
  0x7c   : > { %2603 = vmatprep.subr.bf16.mxu1 %v5607_v6 }
  0x81   : > { %5117 = vmatmul.mubr.bf16.gmra.mrb[28].mxu0 %v5533_v7  ;;  %5165 = vmatmul.mubr.bf16.gmra.mrb[28].mxu1 %v5549_v8 }
  0x82   : > { %5184 = vmatprep.mubr.bf16.mxu0 %v5558_v9 }
  0x89   : > { %5185 = vmatmul.mubr.bf16.vlgmr.msra.gmra.mrb[32].mxu0 %v5559_v10  ;;  %v5586_v10 = vld [vmem:[%s5855_s27 + $0x20] sm:$0xff]  }
  0x8a   : > { %5188 = vmatprep.mubr.bf16.mxu0 %v5560_v11  ;;  %5217 = vmatpush3.bf16.msra.mxu0 %v5568_v2 }
  0x8b   : > { %5218 = vmatprep.subr.bf16.mxu0 %v5569_v12 }
  0x8e   : > { %5219 = vmatpush3.bf16.msra.mxu0 %v5569_v12 }
  0x8f   : > { %5220 = vmatprep.subr.bf16.mxu0 %v5572_v13 }
  0x91   : > { %5189 = vmatmul.mubr.bf16.gmra.mrb[36].mxu0 %v5561_v14  ;;  %v5605_v14 = vld [vmem:[%s5867_s1 + $0x78] ss:$12 sps:$4 sm:$0xff]  }
  0x92   : > { %5192 = vmatprep.mubr.bf16.mxu0 %v5562_v15  ;;  %5221 = vmatpush3.bf16.msra.mxu0 %v5572_v13 }
  0x93   : > { %5222 = vmatprep.subr.bf16.mxu0 %v5573_v16  ;;  %2604 = vmatpush1.bf16.msra.mxu1 %v5605_v14 }
  0x96   : > { %5223 = vmatpush3.bf16.msra.mxu0 %v5573_v16 }
  0x97   : > { %5224 = vmatprep.subr.bf16.mxu0 %v5576_v17 }
  0x99   : > { %5193 = vmatmul.mubr.bf16.gmra.mrb[40].mxu0 %v5563_v18 }
  0x9a   : > { %5196 = vmatprep.mubr.bf16.mxu0 %v5564_v19  ;;  %5225 = vmatpush3.bf16.msra.mxu0 %v5576_v17 }
  0x9b   : > { %5226 = vmatprep.subr.bf16.mxu0 %v5577_v20 }
  0x9e   : > { %5227 = vmatpush3.bf16.msra.mxu0 %v5577_v20 }
  0x9f   : > { %5228 = vmatprep.subr.bf16.mxu0 %v5580_v21 }
  0xa1   : > { %5197 = vmatmul.mubr.bf16.gmra.mrb[44].mxu0 %v5565_v22 }
  0xa2   : > { %5200 = vmatprep.mubr.bf16.mxu0 %v5566_v23  ;;  %5229 = vmatpush3.bf16.msra.mxu0 %v5580_v21  ;;  %v5587_v21 = vld [vmem:[%s5855_s27 + $0x28] sm:$0xff]  }
  0xa3   : > { %5230 = vmatprep.subr.bf16.mxu0 %v5581_v24 }
  0xa6   : > { %5231 = vmatpush3.bf16.msra.mxu0 %v5581_v24 }
  0xa7   : > { %5264 = vmatprep.subr.bf16.mxu0 %v5582_v32 }
  0xa9   : > { %5201 = vmatmul.mubr.bf16.gmra.mrb[48].mxu0 %v5567_v25  ;;  %v5588_v25 = vld [vmem:[%s5855_s27 + $0x30] sm:$0xff]  }
  0xaa   : > { %5204 = vmatprep.mubr.bf16.mxu0 %v5570_v26 }
  0xb1   : > { %5205 = vmatmul.mubr.bf16.gmra.mrb[52].mxu0 %v5571_v27 }
  0xb2   : > { %5208 = vmatprep.mubr.bf16.mxu0 %v5574_v28 }
  0xb9   : > { %5209 = vmatmul.mubr.bf16.gmra.mrb[56].mxu0 %v5575_v29 }
  0xba   : > { %5212 = vmatprep.mubr.bf16.mxu0 %v5578_v30 }
  0xc1   : > { %5213 = vmatmul.mubr.bf16.gmra.mrb[60].mxu0 %v5579_v31 }
 0x11c   : > { %v5090_v35 = vpop.f32.mrb[0].mxu0  ;;  %v6123_v36 = vpop.f32.mrb[0].mxu1 }
 0x11d   : > { %v1078_v38 = vpop.f32.mrb[1].mxu0  ;;  %v6126_v39 = vpop.f32.mrb[1].mxu1 }
 0x11e   : > { %v5091_v40 = vpop.f32.mrb[2].mxu0  ;;  %v6128_v41 = vpop.f32.mrb[2].mxu1 }
 0x11f   : > { %v1206_v43 = vpack.c.bf16 %v5091_v40, %v5090_v35  ;;  %v1081_v44 = vpop.f32.mrb[3].mxu0  ;;  %v1511_v45 = vpack.c.bf16 %v6128_v41, %v6123_v36  ;;  %v6133_v46 = vpop.f32.mrb[3].mxu1  ;;  %v5589_v35 = vld [vmem:[%s5855_s27 + $0x38] sm:$0xff]   ;;  %v5610_v36 = vld [vmem:[%s5867_s1 + $0x94] ss:$12 sps:$4 sm:$0xff]  }
 0x120   : > { %v1205_v48 = vpack.c.bf16 %v1081_v44, %v1078_v38  ;;  %v1510_v49 = vpack.c.bf16 %v6133_v46, %v6126_v39  ;;  %v5608_v39 = vld [vmem:[%s5867_s1 + $0x90] ss:$12 sps:$4 sm:$0xff]   ;;  %2605 = vmatprep.subr.bf16.mxu1 %v5610_v36  ;;  %v5613_v41 = vld [vmem:[%s5867_s1 + $0xac] ss:$12 sps:$4 sm:$0xff]   ;;  %v5724_v46 = vmov 0  }
 0x121   : > { %2606 = vmatpush1.bf16.msra.mxu1 %v5608_v39  ;;  %2625 = vmatprep.mubr.bf16.mxu1 %v5724_v46 }
 0x122   : > { %5232 = vmatprep.mubr.bf16.mxu0 %v1205_v48  ;;  %2607 = vmatprep.subr.bf16.mxu1 %v5613_v41 }
 0x123   : > { %5233 = vmatmul.mubr.bf16.vlgmr.msra.gmra.mrb[32].mxu0 %v1206_v43  ;;  %5508 = vset.pattern.permute.xlu0 %v5724_v46 }
 0x124   : > { %v5094_v53 = vpop.f32.mrb[4].mxu0  ;;  %5265 = vmatpush3.bf16.msra.mxu0 %v5582_v32  ;;  %v6141_v54 = vpop.f32.mrb[4].mxu1  ;;  %5509 = vset.pattern.permute.xlu1 %v5724_v46 }
 0x125   : > { %v1094_v55 = vpop.f32.mrb[5].mxu0  ;;  %5266 = vmatprep.subr.bf16.mxu0 %v5583_v50  ;;  %v6144_v57 = vpop.f32.mrb[5].mxu1 }
 0x126   : > { %v5095_v58 = vpop.f32.mrb[6].mxu0  ;;  %v6146_v59 = vpop.f32.mrb[6].mxu1 }
 0x127   : > { %v1208_v61 = vpack.c.bf16 %v5095_v58, %v5094_v53  ;;  %v1097_v62 = vpop.f32.mrb[7].mxu0  ;;  %v1513_v63 = vpack.c.bf16 %v6146_v59, %v6141_v54  ;;  %v6151_v0 = vpop.f32.mrb[7].mxu1  ;;  %v6228_v54 = vld [vmem:[%s6799_s18] ss:$0 sm:$0xff] }
 0x128   : > { %v1207_v2 = vpack.c.bf16 %v1097_v62, %v1094_v55  ;;  %5267 = vmatpush3.bf16.msra.mxu0 %v5583_v50  ;;  %v1512_v3 = vpack.c.bf16 %v6151_v0, %v6144_v57 }
 0x129   : > { %5268 = vmatprep.subr.bf16.mxu0 %v5584_v56 }
 0x12a   : > { %5236 = vmatprep.mubr.bf16.mxu0 %v1207_v2 }
 0x12b   : > { %5237 = vmatmul.mubr.bf16.gmra.mrb[36].mxu0 %v1208_v61 }
 0x12c   : > { %v5098_v7 = vpop.f32.mrb[8].mxu0  ;;  %5269 = vmatpush3.bf16.msra.mxu0 %v5584_v56  ;;  %v6159_v8 = vpop.f32.mrb[8].mxu1 }
 0x12d   : > { %v1110_v9 = vpop.f32.mrb[9].mxu0  ;;  %5270 = vmatprep.subr.bf16.mxu0 %v5585_v4  ;;  %v6162_v11 = vpop.f32.mrb[9].mxu1 }
 0x12e   : > { %v5099_v12 = vpop.f32.mrb[10].mxu0  ;;  %v6164_v13 = vpop.f32.mrb[10].mxu1 }
 0x12f   : > { %v1210_v15 = vpack.c.bf16 %v5099_v12, %v5098_v7  ;;  %v1113_v16 = vpop.f32.mrb[11].mxu0  ;;  %v1515_v17 = vpack.c.bf16 %v6164_v13, %v6159_v8  ;;  %v6169_v18 = vpop.f32.mrb[11].mxu1 }
 0x130   : > { %v1209_v19 = vpack.c.bf16 %v1113_v16, %v1110_v9  ;;  %5271 = vmatpush3.bf16.msra.mxu0 %v5585_v4  ;;  %v1514_v20 = vpack.c.bf16 %v6169_v18, %v6162_v11 }
 0x131   : > { %5272 = vmatprep.subr.bf16.mxu0 %v5586_v10 }
 0x132   : > { %5240 = vmatprep.mubr.bf16.mxu0 %v1209_v19 }
 0x133   : > { %5241 = vmatmul.mubr.bf16.gmra.mrb[40].mxu0 %v1210_v15 }
 0x134   : > { %v5102_v22 = vpop.f32.mrb[12].mxu0  ;;  %5273 = vmatpush3.bf16.msra.mxu0 %v5586_v10  ;;  %v6174_v23 = vpop.f32.mrb[12].mxu1 }
 0x135   : > { %v1126_v24 = vpop.f32.mrb[13].mxu0  ;;  %5274 = vmatprep.subr.bf16.mxu0 %v5587_v21  ;;  %v6177_v26 = vpop.f32.mrb[13].mxu1 }
 0x136   : > { %v5103_v27 = vpop.f32.mrb[14].mxu0  ;;  %v6179_v28 = vpop.f32.mrb[14].mxu1 }
 0x137   : > { %v1212_v29 = vpack.c.bf16 %v5103_v27, %v5102_v22  ;;  %v1129_v30 = vpop.f32.mrb[15].mxu0  ;;  %v1517_v31 = vpack.c.bf16 %v6179_v28, %v6174_v23  ;;  %v6183_v32 = vpop.f32.mrb[15].mxu1 }
 0x138   : > { %v1211_v33 = vpack.c.bf16 %v1129_v30, %v1126_v24  ;;  %5275 = vmatpush3.bf16.msra.mxu0 %v5587_v21  ;;  %v1516_v34 = vpack.c.bf16 %v6183_v32, %v6177_v26  ;;  %v5615_v32 = vld [vmem:[%s5867_s1 + $0x20] ss:$12 sps:$4 sm:$0xff]  }
 0x139   : > { %5276 = vmatprep.subr.bf16.mxu0 %v5588_v25 }
 0x13a   : > { %5244 = vmatprep.mubr.bf16.mxu0 %v1211_v33 }
 0x13b   : > { %5245 = vmatmul.mubr.bf16.gmra.mrb[44].mxu0 %v1212_v29 }
 0x13c   : > { %v5106_v37 = vpop.f32.mrb[16].mxu0  ;;  %5277 = vmatpush3.bf16.msra.mxu0 %v5588_v25  ;;  %v6188_v38 = vpop.f32.mrb[16].mxu1 }
 0x13d   : > { %v1142_v40 = vpop.f32.mrb[17].mxu0  ;;  %5278 = vmatprep.subr.bf16.mxu0 %v5589_v35  ;;  %v1447_v42 = vpop.f32.mrb[17].mxu1 }
 0x13e   : > { %v5107_v43 = vpop.f32.mrb[18].mxu0  ;;  %v5155_v44 = vpop.f32.mrb[18].mxu1 }
 0x13f   : > { %v1214_v47 = vpack.c.bf16 %v5107_v43, %v5106_v37  ;;  %v1145_v48 = vpop.f32.mrb[19].mxu0  ;;  %v1519_v50 = vpack.c.bf16 %v5155_v44, %v6188_v38  ;;  %v1450_v51 = vpop.f32.mrb[19].mxu1 }
 0x140   : > { %v1213_v52 = vpack.c.bf16 %v1145_v48, %v1142_v40  ;;  %5279 = vmatpush3.bf16.msra.mxu0 %v5589_v35  ;;  %v1518_v53 = vpack.c.bf16 %v1450_v51, %v1447_v42 }
 0x142   : > { %5248 = vmatprep.mubr.bf16.mxu0 %v1213_v52 }
 0x143   : > { %5249 = vmatmul.mubr.bf16.gmra.mrb[48].mxu0 %v1214_v47 }
 0x144   : > { %v5110_v55 = vpop.f32.mrb[20].mxu0  ;;  %v5158_v56 = vpop.f32.mrb[20].mxu1 }
 0x145   : > { %v1158_v58 = vpop.f32.mrb[21].mxu0  ;;  %v1463_v60 = vpop.f32.mrb[21].mxu1 }
 0x146   : > { %v5111_v61 = vpop.f32.mrb[22].mxu0  ;;  %v5159_v62 = vpop.f32.mrb[22].mxu1 }
 0x147   : > { %v1216_v1 = vpack.c.bf16 %v5111_v61, %v5110_v55  ;;  %v1161_v2 = vpop.f32.mrb[23].mxu0  ;;  %v1521_v4 = vpack.c.bf16 %v5159_v62, %v5158_v56  ;;  %v1466_v5 = vpop.f32.mrb[23].mxu1 }
 0x148   : > { %v1215_v6 = vpack.c.bf16 %v1161_v2, %v1158_v58  ;;  %v1520_v7 = vpack.c.bf16 %v1466_v5, %v1463_v60  ;;  %v5616_v58 = vld [vmem:[%s5867_s1 + $0x38] ss:$12 sps:$4 sm:$0xff]  }
 0x14a   : > { %5252 = vmatprep.mubr.bf16.mxu0 %v1215_v6  ;;  %v5617_v6 = vld [vmem:[%s5867_s1 + $0x50] ss:$12 sps:$4 sm:$0xff]  }
 0x14b   : > { %5253 = vmatmul.mubr.bf16.gmra.mrb[52].mxu0 %v1216_v1 }
 0x14c   : > { %v5114_v9 = vpop.f32.mrb[24].mxu0  ;;  %v5162_v10 = vpop.f32.mrb[24].mxu1 }
 0x14d   : > { %v1174_v12 = vpop.f32.mrb[25].mxu0  ;;  %v1479_v14 = vpop.f32.mrb[25].mxu1 }
 0x14e   : > { %v5115_v15 = vpop.f32.mrb[26].mxu0  ;;  %v5163_v16 = vpop.f32.mrb[26].mxu1 }
 0x14f   : > { %v1218_v19 = vpack.c.bf16 %v5115_v15, %v5114_v9  ;;  %v1177_v21 = vpop.f32.mrb[27].mxu0  ;;  %v1523_v22 = vpack.c.bf16 %v5163_v16, %v5162_v10  ;;  %v1482_v24 = vpop.f32.mrb[27].mxu1 }
 0x150   : > { %v1217_v25 = vpack.c.bf16 %v1177_v21, %v1174_v12  ;;  %v1522_v27 = vpack.c.bf16 %v1482_v24, %v1479_v14 }
 0x152   : > { %5256 = vmatprep.mubr.bf16.mxu0 %v1217_v25 }
 0x153   : > { %5257 = vmatmul.mubr.bf16.gmra.mrb[56].mxu0 %v1218_v19  ;;  %v5618_v19 = vld [vmem:[%s5867_s1 + $0x68] ss:$12 sps:$4 sm:$0xff]  }
 0x154   : > { %v5118_v29 = vpop.f32.mrb[28].mxu0  ;;  %v5166_v30 = vpop.f32.mrb[28].mxu1 }
 0x155   : > { %v1190_v33 = vpop.f32.mrb[29].mxu0  ;;  %v1495_v35 = vpop.f32.mrb[29].mxu1 }
 0x156   : > { %v5119_v37 = vpop.f32.mrb[30].mxu0  ;;  %v5167_v38 = vpop.f32.mrb[30].mxu1 }
 0x157   : > { %v1220_v40 = vpack.c.bf16 %v5119_v37, %v5118_v29  ;;  %v1193_v42 = vpop.f32.mrb[31].mxu0  ;;  %v1525_v43 = vpack.c.bf16 %v5167_v38, %v5166_v30  ;;  %v1498_v44 = vpop.f32.mrb[31].mxu1 }
 0x158   : > { %v1219_v47 = vpack.c.bf16 %v1193_v42, %v1190_v33  ;;  %v1524_v48 = vpack.c.bf16 %v1498_v44, %v1495_v35  ;;  %v5619_v33 = vld [vmem:[%s5867_s1 + $0x80] ss:$12 sps:$4 sm:$0xff]  }
 0x15a   : > { %5260 = vmatprep.mubr.bf16.mxu0 %v1219_v47  ;;  %v5620_v47 = vld [vmem:[%s5867_s1 + $0x98] ss:$12 sps:$4 sm:$0xff]  }
 0x15b   : > { %5261 = vmatmul.mubr.bf16.gmra.mrb[60].mxu0 %v1220_v40 }
 0x15c   : > { %5280 = vmatprep.mubr.bf16.mxu0 %v1510_v49  ;;  %v5614_v49 = vld [vmem:[%s5867_s1 + $0x8] ss:$12 sps:$4 sm:$0xff]  }
 0x163   : > { %5281 = vmatmul.mubr.bf16.vlgmr.msra.gmra.mrb[32].mxu0 %v1511_v45  ;;  %v5611_v45 = vld [vmem:[%s5867_s1 + $0xa8] ss:$12 sps:$4 sm:$0xff]  }
 0x164   : > { %5284 = vmatprep.mubr.bf16.mxu0 %v1512_v3  ;;  %2608 = vmatpush1.bf16.msra.mxu1 %v5611_v45 }
 0x165   : > { %5312 = vmatprep.subr.bf16.mxu1 %v5614_v49 }
 0x16b   : > { %5285 = vmatmul.mubr.bf16.gmra.mrb[36].mxu0 %v1513_v63 }
 0x16c   : > { %5288 = vmatprep.mubr.bf16.mxu0 %v1514_v20 }
 0x173   : > { %5289 = vmatmul.mubr.bf16.gmra.mrb[40].mxu0 %v1515_v17 }
 0x174   : > { %5292 = vmatprep.mubr.bf16.mxu0 %v1516_v34 }
 0x17b   : > { %5293 = vmatmul.mubr.bf16.gmra.mrb[44].mxu0 %v1517_v31 }
 0x17c   : > { %5296 = vmatprep.mubr.bf16.mxu0 %v1518_v53 }
 0x183   : > { %5297 = vmatmul.mubr.bf16.gmra.mrb[48].mxu0 %v1519_v50 }
 0x184   : > { %5300 = vmatprep.mubr.bf16.mxu0 %v1520_v7 }
 0x18b   : > { %5301 = vmatmul.mubr.bf16.gmra.mrb[52].mxu0 %v1521_v4 }
 0x18c   : > { %5304 = vmatprep.mubr.bf16.mxu0 %v1522_v27 }
 0x193   : > { %5305 = vmatmul.mubr.bf16.gmra.mrb[56].mxu0 %v1523_v22 }
 0x194   : > { %5308 = vmatprep.mubr.bf16.mxu0 %v1524_v48 }
 0x19b   : > { %5309 = vmatmul.mubr.bf16.gmra.mrb[60].mxu0 %v1525_v43 }
 0x236   : > { %v5282_v57 = vpop.f32.mrb[32].mxu0 }
 0x237   : > { %v2338_v59 = vadd.f32 %v5282_v57, %v6228_v54  ;;  %v2170_v63 = vpop.f32.mrb[33].mxu0 }
 0x238   : > { %v2336_v0 = vadd.f32 %v6228_v54, %v2170_v63  ;;  %v5283_v3 = vpop.f32.mrb[34].mxu0 }
 0x239   : > { %v2339_v8 = vadd.f32 %v5283_v3, %v6228_v54  ;;  %v2173_v11 = vpop.f32.mrb[35].mxu0  ;;  %v2370_v17 = vmax.f32 %v2338_v59, 0.0  ;;  %v5621_v59 = vld [vmem:[%s5867_s1 + $0xb0] ss:$12 sps:$4 sm:$0xff]  }
 0x23a   : > { %v2337_v13 = vadd.f32 %v6228_v54, %v2173_v11  ;;  %v2368_v20 = vmax.f32 %v2336_v0, 0.0 }
 0x23b   : > { %v2371_v18 = vmax.f32 %v2339_v8, 0.0 }
 0x23c   : > { %v2369_v23 = vmax.f32 %v2337_v13, 0.0 }
 0x23d   : > { %v6234_v26 = vpack.c.bf16 %v2371_v18, %v2370_v17 }
 0x23e   : > { %v6236_v28 = vpack.c.bf16 %v2369_v23, %v2368_v20  ;;  %v5286_v31 = vpop.f32.mrb[36].mxu0 }
 0x23f   : > { %v2342_v34 = vadd.f32 %v5286_v31, %v6228_v54  ;;  %v2186_v50 = vpop.f32.mrb[37].mxu0 }
 0x240   : > { %v2340_v51 = vadd.f32 %v6228_v54, %v2186_v50  ;;  %v5287_v52 = vpop.f32.mrb[38].mxu0  ;;  %2626 = vmatmul.mubr.bf16.vlgmr.msra.gmra.mrb[32].mxu1 %v6236_v28 }
 0x241   : > { %v2343_v53 = vadd.f32 %v5287_v52, %v6228_v54  ;;  %v2189_v55 = vpop.f32.mrb[39].mxu0  ;;  %2635 = vmatprep.mubr.bf16.mxu1 %v5724_v46  ;;  %5313 = vmatpush3.bf16.msra.mxu1 %v5614_v49  ;;  %v2374_v60 = vmax.f32 %v2342_v34, 0.0 }
 0x242   : > { %v2341_v56 = vadd.f32 %v6228_v54, %v2189_v55  ;;  %5314 = vmatprep.subr.bf16.mxu1 %v5615_v32  ;;  %v2372_v62 = vmax.f32 %v2340_v51, 0.0 }
 0x243   : > { %v2375_v61 = vmax.f32 %v2343_v53, 0.0 }
 0x244   : > { %v2373_v1 = vmax.f32 %v2341_v56, 0.0 }
 0x245   : > { %v6246_v2 = vpack.c.bf16 %v2375_v61, %v2374_v60  ;;  %5315 = vmatpush3.bf16.msra.mxu1 %v5615_v32 }
 0x246   : > { %v6248_v4 = vpack.c.bf16 %v2373_v1, %v2372_v62  ;;  %v5290_v5 = vpop.f32.mrb[40].mxu0  ;;  %5316 = vmatprep.subr.bf16.mxu1 %v5616_v58 }
 0x247   : > { %v2346_v7 = vadd.f32 %v5290_v5, %v6228_v54  ;;  %v2202_v9 = vpop.f32.mrb[41].mxu0 }
 0x248   : > { %v2344_v10 = vadd.f32 %v6228_v54, %v2202_v9  ;;  %v5291_v12 = vpop.f32.mrb[42].mxu0  ;;  %2636 = vmatmul.mubr.bf16.gmra.mrb[36].mxu1 %v6234_v26 }
 0x249   : > { %v2347_v14 = vadd.f32 %v5291_v12, %v6228_v54  ;;  %v2205_v15 = vpop.f32.mrb[43].mxu0  ;;  %2645 = vmatprep.mubr.bf16.mxu1 %v5724_v46  ;;  %5317 = vmatpush3.bf16.msra.mxu1 %v5616_v58  ;;  %v2378_v21 = vmax.f32 %v2346_v7, 0.0 }
 0x24a   : > { %v2345_v16 = vadd.f32 %v6228_v54, %v2205_v15  ;;  %5318 = vmatprep.subr.bf16.mxu1 %v5617_v6  ;;  %v2376_v24 = vmax.f32 %v2344_v10, 0.0 }
 0x24b   : > { %v2379_v22 = vmax.f32 %v2347_v14, 0.0 }
 0x24c   : > { %v2377_v25 = vmax.f32 %v2345_v16, 0.0 }
 0x24d   : > { %v6258_v27 = vpack.c.bf16 %v2379_v22, %v2378_v21  ;;  %5319 = vmatpush3.bf16.msra.mxu1 %v5617_v6 }
 0x24e   : > { %v6260_v29 = vpack.c.bf16 %v2377_v25, %v2376_v24  ;;  %v5294_v30 = vpop.f32.mrb[44].mxu0  ;;  %5320 = vmatprep.subr.bf16.mxu1 %v5618_v19 }
 0x24f   : > { %v2350_v35 = vadd.f32 %v5294_v30, %v6228_v54  ;;  %v2218_v37 = vpop.f32.mrb[45].mxu0 }
 0x250   : > { %v2348_v38 = vadd.f32 %v6228_v54, %v2218_v37  ;;  %v5295_v40 = vpop.f32.mrb[46].mxu0  ;;  %2646 = vmatmul.mubr.bf16.gmra.mrb[40].mxu1 %v6248_v4 }
 0x251   : > { %v2351_v42 = vadd.f32 %v5295_v40, %v6228_v54  ;;  %v2221_v43 = vpop.f32.mrb[47].mxu0  ;;  %2655 = vmatprep.mubr.bf16.mxu1 %v5724_v46  ;;  %5321 = vmatpush3.bf16.msra.mxu1 %v5618_v19  ;;  %v2382_v48 = vmax.f32 %v2350_v35, 0.0 }
 0x252   : > { %v2349_v44 = vadd.f32 %v6228_v54, %v2221_v43  ;;  %5322 = vmatprep.subr.bf16.mxu1 %v5619_v33  ;;  %v2380_v39 = vmax.f32 %v2348_v38, 0.0 }
 0x253   : > { %v2383_v36 = vmax.f32 %v2351_v42, 0.0 }
 0x254   : > { %v2381_v41 = vmax.f32 %v2349_v44, 0.0 }
 0x255   : > { %v6270_v45 = vpack.c.bf16 %v2383_v36, %v2382_v48  ;;  %5323 = vmatpush3.bf16.msra.mxu1 %v5619_v33 }
 0x256   : > { %v6272_v49 = vpack.c.bf16 %v2381_v41, %v2380_v39  ;;  %v5298_v57 = vpop.f32.mrb[48].mxu0  ;;  %5324 = vmatprep.subr.bf16.mxu1 %v5620_v47 }
 0x257   : > { %v2354_v63 = vadd.f32 %v5298_v57, %v6228_v54  ;;  %v2234_v0 = vpop.f32.mrb[49].mxu0 }
 0x258   : > { %v2352_v3 = vadd.f32 %v6228_v54, %v2234_v0  ;;  %v5299_v8 = vpop.f32.mrb[50].mxu0  ;;  %2656 = vmatmul.mubr.bf16.gmra.mrb[44].mxu1 %v6246_v2 }
 0x259   : > { %v2355_v11 = vadd.f32 %v5299_v8, %v6228_v54  ;;  %v2237_v13 = vpop.f32.mrb[51].mxu0  ;;  %2665 = vmatprep.mubr.bf16.mxu1 %v5724_v46  ;;  %5325 = vmatpush3.bf16.msra.mxu1 %v5620_v47  ;;  %v2386_v18 = vmax.f32 %v2354_v63, 0.0 }
 0x25a   : > { %v2353_v17 = vadd.f32 %v6228_v54, %v2237_v13  ;;  %5326 = vmatprep.subr.bf16.mxu1 %v5621_v59  ;;  %v2384_v23 = vmax.f32 %v2352_v3, 0.0 }
 0x25b   : > { %v2387_v20 = vmax.f32 %v2355_v11, 0.0 }
 0x25c   : > { %v2385_v31 = vmax.f32 %v2353_v17, 0.0 }
 0x25d   : > { %v6281_v32 = vpack.c.bf16 %v2387_v20, %v2386_v18  ;;  %5327 = vmatpush3.bf16.msra.mxu1 %v5621_v59 }
 0x25e   : > { %v6283_v34 = vpack.c.bf16 %v2385_v31, %v2384_v23  ;;  %v5302_v50 = vpop.f32.mrb[52].mxu0 }
 0x25f   : > { %v2358_v51 = vadd.f32 %v5302_v50, %v6228_v54  ;;  %v2250_v52 = vpop.f32.mrb[53].mxu0 }
 0x260   : > { %v2356_v53 = vadd.f32 %v6228_v54, %v2250_v52  ;;  %v5303_v55 = vpop.f32.mrb[54].mxu0  ;;  %2666 = vmatmul.mubr.bf16.gmra.mrb[48].mxu1 %v6260_v29 }
 0x261   : > { %v2359_v56 = vadd.f32 %v5303_v55, %v6228_v54  ;;  %v2253_v58 = vpop.f32.mrb[55].mxu0  ;;  %2675 = vmatprep.mubr.bf16.mxu1 %v5724_v46  ;;  %v2390_v61 = vmax.f32 %v2358_v51, 0.0 }
 0x262   : > { %v2357_v60 = vadd.f32 %v6228_v54, %v2253_v58  ;;  %v2388_v1 = vmax.f32 %v2356_v53, 0.0 }
 0x263   : > { %v2391_v62 = vmax.f32 %v2359_v56, 0.0 }
 0x264   : > { %v2389_v5 = vmax.f32 %v2357_v60, 0.0 }
 0x265   : > { %v2411_v6 = vpack.c.bf16 %v2391_v62, %v2390_v61 }
 0x266   : > { %v2410_v7 = vpack.c.bf16 %v2389_v5, %v2388_v1  ;;  %v5306_v9 = vpop.f32.mrb[56].mxu0 }
 0x267   : > { %v2362_v10 = vadd.f32 %v5306_v9, %v6228_v54  ;;  %v2266_v12 = vpop.f32.mrb[57].mxu0 }
 0x268   : > { %v2360_v14 = vadd.f32 %v6228_v54, %v2266_v12  ;;  %v5307_v15 = vpop.f32.mrb[58].mxu0  ;;  %2676 = vmatmul.mubr.bf16.gmra.mrb[52].mxu1 %v6258_v27 }
 0x269   : > { %v2363_v16 = vadd.f32 %v5307_v15, %v6228_v54  ;;  %v2269_v19 = vpop.f32.mrb[59].mxu0  ;;  %2685 = vmatprep.mubr.bf16.mxu1 %v5724_v46  ;;  %v2394_v22 = vmax.f32 %v2362_v10, 0.0 }
 0x26a   : > { %v2361_v21 = vadd.f32 %v6228_v54, %v2269_v19  ;;  %v2392_v25 = vmax.f32 %v2360_v14, 0.0 }
 0x26b   : > { %v2395_v24 = vmax.f32 %v2363_v16, 0.0 }
 0x26c   : > { %v2393_v30 = vmax.f32 %v2361_v21, 0.0 }
 0x26d   : > { %v2413_v33 = vpack.c.bf16 %v2395_v24, %v2394_v22 }
 0x26e   : > { %v2412_v35 = vpack.c.bf16 %v2393_v30, %v2392_v25  ;;  %v5310_v37 = vpop.f32.mrb[60].mxu0 }
 0x26f   : > { %v2366_v38 = vadd.f32 %v5310_v37, %v6228_v54  ;;  %v2282_v40 = vpop.f32.mrb[61].mxu0 }
 0x270   : > { %v2364_v42 = vadd.f32 %v6228_v54, %v2282_v40  ;;  %v5311_v43 = vpop.f32.mrb[62].mxu0  ;;  %2686 = vmatmul.mubr.bf16.gmra.mrb[56].mxu1 %v6272_v49 }
 0x271   : > { %v2367_v44 = vadd.f32 %v5311_v43, %v6228_v54  ;;  %v2285_v47 = vpop.f32.mrb[63].mxu0  ;;  %2695 = vmatprep.mubr.bf16.mxu1 %v5724_v46  ;;  %v2398_v36 = vmax.f32 %v2366_v38, 0.0 }
 0x272   : > { %v2365_v48 = vadd.f32 %v6228_v54, %v2285_v47  ;;  %v2396_v41 = vmax.f32 %v2364_v42, 0.0 }
 0x273   : > { %v2399_v39 = vmax.f32 %v2367_v44, 0.0 }
 0x274   : > { %v2397_v57 = vmax.f32 %v2365_v48, 0.0 }
 0x275   : > { %v2415_v59 = vpack.c.bf16 %v2399_v39, %v2398_v36 }
 0x276   : > { %v2414_v63 = vpack.c.bf16 %v2397_v57, %v2396_v41 }
 0x278   : > { %2696 = vmatmul.mubr.bf16.gmra.mrb[60].mxu1 %v6270_v45 }
 0x279   : > { %2705 = vmatprep.mubr.bf16.mxu1 %v5724_v46 }
 0x280   : > { %2706 = vmatmul.mubr.bf16.gmra.mrb[64].mxu1 %v6283_v34 }
 0x281   : > { %2715 = vmatprep.mubr.bf16.mxu1 %v5724_v46 }
 0x288   : > { %2716 = vmatmul.mubr.bf16.gmra.mrb[68].mxu1 %v6281_v32 }
 0x289   : > { %2725 = vmatprep.mubr.bf16.mxu1 %v5724_v46 }
 0x290   : > { %2726 = vmatmul.mubr.bf16.gmra.mrb[72].mxu1 %v2410_v7 }
 0x291   : > { %2735 = vmatprep.mubr.bf16.mxu1 %v5724_v46 }
 0x298   : > { %2736 = vmatmul.mubr.bf16.gmra.mrb[76].mxu1 %v2411_v6 }
 0x299   : > { %2745 = vmatprep.mubr.bf16.mxu1 %v5724_v46 }
 0x2a0   : > { %2746 = vmatmul.mubr.bf16.gmra.mrb[80].mxu1 %v2412_v35 }
 0x2a1   : > { %2755 = vmatprep.mubr.bf16.mxu1 %v5724_v46 }
 0x2a8   : > { %2756 = vmatmul.mubr.bf16.gmra.mrb[84].mxu1 %v2413_v33 }
 0x2a9   : > { %2765 = vmatprep.mubr.bf16.mxu1 %v5724_v46 }
 0x2b0   : > { %2766 = vmatmul.mubr.bf16.gmra.mrb[88].mxu1 %v2414_v63 }
 0x2b1   : > { %2775 = vmatprep.mubr.bf16.mxu1 %v5724_v46  ;;  %v2450_v46 = vlaneseq }
 0x2b3   : > { %v6324_v54 = vshrl.u32 %v2450_v46, 7 }
 0x2b8   : > { %2776 = vmatmul.mubr.bf16.gmra.mrb[92].mxu1 %v2415_v59 }
 0x2b9   : > { %5328 = vmatprep.mubr.bf16.mxu1 %v6236_v28  ;;  %v6328_v28 = vld [vmem:[%s5876_s26] sm:$0x7] }
 0x2c0   : > { %5329 = vmatmul.mubr.bf16.vlgmr.msra.gmra.mrb[96].mxu1 %v6234_v26  ;;  %v2452_v26 = vsub.s32 0, %v6324_v54 }
 0x2c1   : > { %5332 = vmatprep.mubr.bf16.mxu1 %v6248_v4 }
 0x2c2   : > { %v6332_v4 = vrot.slane %v6328_v28, %v2452_v26 }
 0x2c8   : > { %5333 = vmatmul.mubr.bf16.gmra.mrb[100].mxu1 %v6246_v2  ;;  %v2456_v2 = vsub.s32 1, %v6324_v54 }
 0x2c9   : > { %5336 = vmatprep.mubr.bf16.mxu1 %v6260_v29 }
 0x2d0   : > { %5337 = vmatmul.mubr.bf16.gmra.mrb[104].mxu1 %v6258_v27  ;;  %v6335_v27 = vrot.slane %v6328_v28, %v2456_v2 }
 0x2d1   : > { %5340 = vmatprep.mubr.bf16.mxu1 %v6272_v49 }
 0x2d8   : > { %5341 = vmatmul.mubr.bf16.gmra.mrb[108].mxu1 %v6270_v45 }
 0x2d9   : > { %5344 = vmatprep.mubr.bf16.mxu1 %v6283_v34 }
 0x2e0   : > { %5345 = vmatmul.mubr.bf16.gmra.mrb[112].mxu1 %v6281_v32 }
 0x2e1   : > { %5348 = vmatprep.mubr.bf16.mxu1 %v2410_v7 }
 0x2e8   : > { %5349 = vmatmul.mubr.bf16.gmra.mrb[116].mxu1 %v2411_v6 }
 0x2e9   : > { %5352 = vmatprep.mubr.bf16.mxu1 %v2412_v35 }
 0x2f0   : > { %5353 = vmatmul.mubr.bf16.gmra.mrb[120].mxu1 %v2413_v33 }
 0x2f1   : > { %5356 = vmatprep.mubr.bf16.mxu1 %v2414_v63 }
 0x2f8   : > { %5357 = vmatmul.mubr.bf16.gmra.mrb[124].mxu1 %v2415_v59 }
 0x313   : > { %v2627_v29 = vpop.f32.mrb[32].mxu1 }
 0x314   : > { %v2628_v45 = vadd.f32 %v2627_v29, %v6332_v4  ;;  %v2629_v49 = vpop.f32.mrb[33].mxu1 }
 0x315   : > { %v2630_v0 = vadd.f32 %v2629_v49, %v6335_v27  ;;  %v2631_v3 = vpop.f32.mrb[34].mxu1 }
 0x316   : > { %v2632_v8 = vadd.f32 %v2631_v3, %v6332_v4  ;;  %v2633_v11 = vpop.f32.mrb[35].mxu1  ;;  %v2947_v17 = vmax.f32 %v2628_v45, 0.0 }
 0x317   : > { %v2634_v13 = vadd.f32 %v2633_v11, %v6335_v27  ;;  %v2948_v20 = vmax.f32 %v2630_v0, 0.0 }
 0x318   : > { %v2950_v18 = vmax.f32 %v2632_v8, 0.0 }
 0x319   : > { %v2951_v23 = vmax.f32 %v2634_v13, 0.0 }
 0x31a   : > { %v6341_v31 = vpack.c.bf16 %v2950_v18, %v2947_v17 }
 0x31b   : > { %v4669_v32 = vpack.c.bf16 %v2951_v23, %v2948_v20  ;;  %v2637_v34 = vpop.f32.mrb[36].mxu1 }
 0x31c   : > { %v2638_v50 = vadd.f32 %v2637_v34, %v6332_v4  ;;  %v2639_v51 = vpop.f32.mrb[37].mxu1 }
 0x31d   : > { %4670 = vst [vmem:[#allocation2] sm:$0xff] %v4669_v32   ;;  %v2640_v52 = vadd.f32 %v2639_v51, %v6335_v27  ;;  %v2641_v53 = vpop.f32.mrb[38].mxu1 }
 0x31e   : > { %v2642_v55 = vadd.f32 %v2641_v53, %v6332_v4  ;;  %v2643_v56 = vpop.f32.mrb[39].mxu1  ;;  %v2953_v60 = vmax.f32 %v2638_v50, 0.0 }
 0x31f   : > { %v2644_v58 = vadd.f32 %v2643_v56, %v6335_v27  ;;  %v2954_v62 = vmax.f32 %v2640_v52, 0.0 }
 0x320   : > { %v2956_v61 = vmax.f32 %v2642_v55, 0.0 }
 0x321   : > { %v2957_v1 = vmax.f32 %v2644_v58, 0.0 }
 0x322   : > { %v6347_v5 = vpack.c.bf16 %v2956_v61, %v2953_v60 }
 0x323   : > { %v4674_v6 = vpack.c.bf16 %v2957_v1, %v2954_v62  ;;  %v2647_v7 = vpop.f32.mrb[40].mxu1 }
 0x324   : > { %v2648_v9 = vadd.f32 %v2647_v7, %v6332_v4  ;;  %v2649_v10 = vpop.f32.mrb[41].mxu1 }
 0x325   : > { %4753 = vst [vmem:[#allocation2 + $0x8] sm:$0xff] %v4674_v6   ;;  %v2650_v12 = vadd.f32 %v2649_v10, %v6335_v27  ;;  %v2651_v14 = vpop.f32.mrb[42].mxu1 }
 0x326   : > { %v2652_v15 = vadd.f32 %v2651_v14, %v6332_v4  ;;  %v2653_v16 = vpop.f32.mrb[43].mxu1  ;;  %v2959_v21 = vmax.f32 %v2648_v9, 0.0 }
 0x327   : > { %v2654_v19 = vadd.f32 %v2653_v16, %v6335_v27  ;;  %v2960_v24 = vmax.f32 %v2650_v12, 0.0 }
 0x328   : > { %v2962_v22 = vmax.f32 %v2652_v15, 0.0 }
 0x329   : > { %v2963_v25 = vmax.f32 %v2654_v19, 0.0 }
 0x32a   : > { %v6353_v30 = vpack.c.bf16 %v2962_v22, %v2959_v21 }
 0x32b   : > { %v4679_v33 = vpack.c.bf16 %v2963_v25, %v2960_v24  ;;  %v2657_v35 = vpop.f32.mrb[44].mxu1 }
 0x32c   : > { %v2658_v37 = vadd.f32 %v2657_v35, %v6332_v4  ;;  %v2659_v38 = vpop.f32.mrb[45].mxu1 }
 0x32d   : > { %4754 = vst [vmem:[#allocation2 + $0x10] sm:$0xff] %v4679_v33   ;;  %v2660_v40 = vadd.f32 %v2659_v38, %v6335_v27  ;;  %v2661_v42 = vpop.f32.mrb[46].mxu1 }
 0x32e   : > { %v2662_v43 = vadd.f32 %v2661_v42, %v6332_v4  ;;  %v2663_v44 = vpop.f32.mrb[47].mxu1  ;;  %v2965_v48 = vmax.f32 %v2658_v37, 0.0 }
 0x32f   : > { %v2664_v47 = vadd.f32 %v2663_v44, %v6335_v27  ;;  %v2966_v39 = vmax.f32 %v2660_v40, 0.0 }
 0x330   : > { %v2968_v36 = vmax.f32 %v2662_v43, 0.0 }
 0x331   : > { %v2969_v41 = vmax.f32 %v2664_v47, 0.0 }
 0x332   : > { %v6359_v57 = vpack.c.bf16 %v2968_v36, %v2965_v48 }
 0x333   : > { %v4684_v59 = vpack.c.bf16 %v2969_v41, %v2966_v39  ;;  %v2667_v63 = vpop.f32.mrb[48].mxu1 }
 0x334   : > { %v2668_v46 = vadd.f32 %v2667_v63, %v6332_v4  ;;  %v2669_v26 = vpop.f32.mrb[49].mxu1 }
 0x335   : > { %4755 = vst [vmem:[#allocation2 + $0x18] sm:$0xff] %v4684_v59   ;;  %v2670_v2 = vadd.f32 %v2669_v26, %v6335_v27  ;;  %v2671_v29 = vpop.f32.mrb[50].mxu1 }
 0x336   : > { %v2672_v45 = vadd.f32 %v2671_v29, %v6332_v4  ;;  %v2673_v49 = vpop.f32.mrb[51].mxu1  ;;  %v2971_v3 = vmax.f32 %v2668_v46, 0.0 }
 0x337   : > { %v2674_v0 = vadd.f32 %v2673_v49, %v6335_v27  ;;  %v2972_v11 = vmax.f32 %v2670_v2, 0.0 }
 0x338   : > { %v2974_v8 = vmax.f32 %v2672_v45, 0.0 }
 0x339   : > { %v2975_v13 = vmax.f32 %v2674_v0, 0.0 }
 0x33a   : > { %v6365_v17 = vpack.c.bf16 %v2974_v8, %v2971_v3  ;;  %v5627_v3 = vld [vmem:[%s6800_s8 + $0x4] ss:$8 sps:$4 sm:$0xff]  }
 0x33b   : > { %v4689_v18 = vpack.c.bf16 %v2975_v13, %v2972_v11  ;;  %v2677_v20 = vpop.f32.mrb[52].mxu1  ;;  %3412 = vmatprep.mubr.bf16.mxu1 %v5627_v3 }
 0x33c   : > { %v2678_v23 = vadd.f32 %v2677_v20, %v6332_v4  ;;  %v2679_v32 = vpop.f32.mrb[53].mxu1 }
 0x33d   : > { %4756 = vst [vmem:[#allocation2 + $0x20] sm:$0xff] %v4689_v18   ;;  %v2680_v34 = vadd.f32 %v2679_v32, %v6335_v27  ;;  %v2681_v50 = vpop.f32.mrb[54].mxu1 }
 0x33e   : > { %v2682_v51 = vadd.f32 %v2681_v50, %v6332_v4  ;;  %v2683_v52 = vpop.f32.mrb[55].mxu1  ;;  %v2977_v55 = vmax.f32 %v2678_v23, 0.0  ;;  %v5624_v23 = vld [vmem:[%s6801_s9 + $0x4] ss:$8 sps:$4 sm:$0xff]  }
 0x33f   : > { %v2684_v53 = vadd.f32 %v2683_v52, %v6335_v27  ;;  %v2978_v58 = vmax.f32 %v2680_v34, 0.0  ;;  %3235 = vmatprep.mubr.bf16.mxu0 %v5624_v23 }
 0x340   : > { %v2980_v56 = vmax.f32 %v2682_v51, 0.0 }
 0x341   : > { %v2981_v60 = vmax.f32 %v2684_v53, 0.0 }
 0x342   : > { %v6371_v61 = vpack.c.bf16 %v2980_v56, %v2977_v55 }
 0x343   : > { %v4694_v62 = vpack.c.bf16 %v2981_v60, %v2978_v58  ;;  %v2687_v1 = vpop.f32.mrb[56].mxu1 }
 0x344   : > { %v2688_v6 = vadd.f32 %v2687_v1, %v6332_v4  ;;  %v2689_v7 = vpop.f32.mrb[57].mxu1 }
 0x345   : > { %4757 = vst [vmem:[#allocation2 + $0x28] sm:$0xff] %v4694_v62   ;;  %v2690_v9 = vadd.f32 %v2689_v7, %v6335_v27  ;;  %v2691_v10 = vpop.f32.mrb[58].mxu1 }
 0x346   : > { %v2692_v12 = vadd.f32 %v2691_v10, %v6332_v4  ;;  %v2693_v14 = vpop.f32.mrb[59].mxu1  ;;  %v2983_v16 = vmax.f32 %v2688_v6, 0.0 }
 0x347   : > { %v2694_v15 = vadd.f32 %v2693_v14, %v6335_v27  ;;  %v2984_v21 = vmax.f32 %v2690_v9, 0.0 }
 0x348   : > { %v2986_v19 = vmax.f32 %v2692_v12, 0.0 }
 0x349   : > { %v2987_v22 = vmax.f32 %v2694_v15, 0.0 }
 0x34a   : > { %v6377_v24 = vpack.c.bf16 %v2986_v19, %v2983_v16 }
 0x34b   : > { %v4699_v25 = vpack.c.bf16 %v2987_v22, %v2984_v21  ;;  %v2697_v33 = vpop.f32.mrb[60].mxu1 }
 0x34c   : > { %v2698_v35 = vadd.f32 %v2697_v33, %v6332_v4  ;;  %v2699_v37 = vpop.f32.mrb[61].mxu1 }
 0x34d   : > { %4758 = vst [vmem:[#allocation2 + $0x30] sm:$0xff] %v4699_v25   ;;  %v2700_v38 = vadd.f32 %v2699_v37, %v6335_v27  ;;  %v2701_v40 = vpop.f32.mrb[62].mxu1 }
 0x34e   : > { %v2702_v42 = vadd.f32 %v2701_v40, %v6332_v4  ;;  %v2703_v43 = vpop.f32.mrb[63].mxu1  ;;  %v2989_v47 = vmax.f32 %v2698_v35, 0.0 }
 0x34f   : > { %v2704_v44 = vadd.f32 %v2703_v43, %v6335_v27  ;;  %v2990_v36 = vmax.f32 %v2700_v38, 0.0 }
 0x350   : > { %v2992_v48 = vmax.f32 %v2702_v42, 0.0 }
 0x351   : > { %v2993_v39 = vmax.f32 %v2704_v44, 0.0 }
 0x352   : > { %v6383_v41 = vpack.c.bf16 %v2992_v48, %v2989_v47 }
 0x353   : > { %v4704_v59 = vpack.c.bf16 %v2993_v39, %v2990_v36  ;;  %v2707_v63 = vpop.f32.mrb[64].mxu1 }
 0x354   : > { %v2708_v46 = vadd.f32 %v2707_v63, %v6332_v4  ;;  %v2709_v26 = vpop.f32.mrb[65].mxu1 }
 0x355   : > { %4759 = vst [vmem:[#allocation2 + $0x38] sm:$0xff] %v4704_v59   ;;  %v2710_v2 = vadd.f32 %v2709_v26, %v6335_v27  ;;  %v2711_v29 = vpop.f32.mrb[66].mxu1 }
 0x356   : > { %v2712_v45 = vadd.f32 %v2711_v29, %v6332_v4  ;;  %v2713_v49 = vpop.f32.mrb[67].mxu1  ;;  %v2995_v8 = vmax.f32 %v2708_v46, 0.0 }
 0x357   : > { %v2714_v0 = vadd.f32 %v2713_v49, %v6335_v27  ;;  %v2996_v13 = vmax.f32 %v2710_v2, 0.0 }
 0x358   : > { %v2998_v11 = vmax.f32 %v2712_v45, 0.0 }
 0x359   : > { %v2999_v18 = vmax.f32 %v2714_v0, 0.0 }
 0x35a   : > { %v3051_v20 = vpack.c.bf16 %v2998_v11, %v2995_v8 }
 0x35b   : > { %v4709_v32 = vpack.c.bf16 %v2999_v18, %v2996_v13  ;;  %v2717_v34 = vpop.f32.mrb[68].mxu1 }
 0x35c   : > { %v2718_v50 = vadd.f32 %v2717_v34, %v6332_v4  ;;  %v2719_v51 = vpop.f32.mrb[69].mxu1  ;;  %4976 = vmatprep.subr.bf16.mxu1 %v3051_v20 }
 0x35d   : > { %4760 = vst [vmem:[#allocation2 + $0x40] sm:$0xff] %v4709_v32   ;;  %v2720_v52 = vadd.f32 %v2719_v51, %v6335_v27  ;;  %v2721_v53 = vpop.f32.mrb[70].mxu1  ;;  %4977 = vmatpush3.bf16.msra.mxu1 %v6341_v31 }
 0x35e   : > { %v2722_v55 = vadd.f32 %v2721_v53, %v6332_v4  ;;  %v2723_v56 = vpop.f32.mrb[71].mxu1  ;;  %v3001_v60 = vmax.f32 %v2718_v50, 0.0 }
 0x35f   : > { %v2724_v58 = vadd.f32 %v2723_v56, %v6335_v27  ;;  %v3002_v1 = vmax.f32 %v2720_v52, 0.0 }
 0x360   : > { %v3004_v62 = vmax.f32 %v2722_v55, 0.0 }
 0x361   : > { %v3005_v6 = vmax.f32 %v2724_v58, 0.0 }
 0x362   : > { %v3052_v7 = vpack.c.bf16 %v3004_v62, %v3001_v60 }
 0x363   : > { %v4714_v9 = vpack.c.bf16 %v3005_v6, %v3002_v1  ;;  %v2727_v10 = vpop.f32.mrb[72].mxu1 }
 0x364   : > { %v2728_v12 = vadd.f32 %v2727_v10, %v6332_v4  ;;  %v2729_v14 = vpop.f32.mrb[73].mxu1  ;;  %4978 = vmatprep.subr.bf16.mxu1 %v3052_v7 }
 0x365   : > { %4761 = vst [vmem:[#allocation2 + $0x48] sm:$0xff] %v4714_v9   ;;  %v2730_v15 = vadd.f32 %v2729_v14, %v6335_v27  ;;  %v2731_v31 = vpop.f32.mrb[74].mxu1  ;;  %4979 = vmatpush3.bf16.msra.mxu1 %v6347_v5 }
 0x366   : > { %v2732_v16 = vadd.f32 %v2731_v31, %v6332_v4  ;;  %v2733_v19 = vpop.f32.mrb[75].mxu1  ;;  %v3007_v22 = vmax.f32 %v2728_v12, 0.0 }
 0x367   : > { %v2734_v21 = vadd.f32 %v2733_v19, %v6335_v27  ;;  %v3008_v33 = vmax.f32 %v2730_v15, 0.0 }
 0x368   : > { %v3010_v25 = vmax.f32 %v2732_v16, 0.0 }
 0x369   : > { %v3011_v35 = vmax.f32 %v2734_v21, 0.0 }
 0x36a   : > { %v3053_v37 = vpack.c.bf16 %v3010_v25, %v3007_v22 }
 0x36b   : > { %v4719_v38 = vpack.c.bf16 %v3011_v35, %v3008_v33  ;;  %v2737_v40 = vpop.f32.mrb[76].mxu1 }
 0x36c   : > { %v2738_v42 = vadd.f32 %v2737_v40, %v6332_v4  ;;  %v2739_v43 = vpop.f32.mrb[77].mxu1  ;;  %4980 = vmatprep.subr.bf16.mxu1 %v3053_v37 }
 0x36d   : > { %4762 = vst [vmem:[#allocation2 + $0x50] sm:$0xff] %v4719_v38   ;;  %v2740_v44 = vadd.f32 %v2739_v43, %v6335_v27  ;;  %v2741_v5 = vpop.f32.mrb[78].mxu1  ;;  %4981 = vmatpush3.bf16.msra.mxu1 %v6353_v30  ;;  %v2460_v43 = vsub.s32 2, %v6324_v54 }
 0x36e   : > { %v2742_v47 = vadd.f32 %v2741_v5, %v6332_v4  ;;  %v2743_v48 = vpop.f32.mrb[79].mxu1  ;;  %v3013_v39 = vmax.f32 %v2738_v42, 0.0 }
 0x36f   : > { %v2744_v36 = vadd.f32 %v2743_v48, %v6335_v27  ;;  %v3014_v63 = vmax.f32 %v2740_v44, 0.0 }
 0x370   : > { %v3016_v59 = vmax.f32 %v2742_v47, 0.0 }
 0x371   : > { %v3017_v46 = vmax.f32 %v2744_v36, 0.0 }
 0x372   : > { %v3054_v26 = vpack.c.bf16 %v3016_v59, %v3013_v39  ;;  %v6432_v59 = vrot.slane %v6328_v28, %v2460_v43  ;;  %v5630_v28 = vld [vmem:[%s6800_s8 + $0x14] ss:$8 sps:$4 sm:$0xff]  }
 0x373   : > { %v4724_v2 = vpack.c.bf16 %v3017_v46, %v3014_v63  ;;  %v2747_v29 = vpop.f32.mrb[80].mxu1 }
 0x374   : > { %v2748_v45 = vadd.f32 %v2747_v29, %v6332_v4  ;;  %v2749_v49 = vpop.f32.mrb[81].mxu1  ;;  %4982 = vmatprep.subr.bf16.mxu1 %v3054_v26 }
 0x375   : > { %4763 = vst [vmem:[#allocation2 + $0x58] sm:$0xff] %v4724_v2   ;;  %v2750_v0 = vadd.f32 %v2749_v49, %v6335_v27  ;;  %v2751_v30 = vpop.f32.mrb[82].mxu1  ;;  %4983 = vmatpush3.bf16.msra.mxu1 %v6359_v57  ;;  %v3477_v49 = vld [vmem:[%s6802_s22] sm:$0xff] }
 0x376   : > { %v2752_v3 = vadd.f32 %v2751_v30, %v6332_v4  ;;  %v2753_v8 = vpop.f32.mrb[83].mxu1  ;;  %v3019_v13 = vmax.f32 %v2748_v45, 0.0  ;;  %3495 = vperm.xlu0 %5508, %v3477_v49  }
 0x377   : > { %v2754_v11 = vadd.f32 %v2753_v8, %v6335_v27  ;;  %v3020_v20 = vmax.f32 %v2750_v0, 0.0  ;;  %v3479_v0 = vld [vmem:[%s6802_s22 + $0x10] sm:$0xff] }
 0x378   : > { %v3022_v18 = vmax.f32 %v2752_v3, 0.0  ;;  %3505 = vperm.xlu1 %5509, %v3479_v0  }
 0x379   : > { %v3023_v23 = vmax.f32 %v2754_v11, 0.0  ;;  %v3480_v11 = vld [vmem:[%s6802_s22 + $0x18] sm:$0xff] }
 0x37a   : > { %v3055_v32 = vpack.c.bf16 %v3022_v18, %v3019_v13 }
 0x37b   : > { %v4729_v34 = vpack.c.bf16 %v3023_v23, %v3020_v20  ;;  %v2757_v50 = vpop.f32.mrb[84].mxu1 }
 0x37c   : > { %v2758_v51 = vadd.f32 %v2757_v50, %v6332_v4  ;;  %v2759_v52 = vpop.f32.mrb[85].mxu1  ;;  %4984 = vmatprep.subr.bf16.mxu1 %v3055_v32  ;;  %3510 = vperm.xlu1 %5509, %v3480_v11  }
 0x37d   : > { %4764 = vst [vmem:[#allocation2 + $0x60] sm:$0xff] %v4729_v34   ;;  %v2760_v53 = vadd.f32 %v2759_v52, %v6335_v27  ;;  %v2761_v57 = vpop.f32.mrb[86].mxu1  ;;  %4985 = vmatpush3.bf16.msra.mxu1 %v6365_v17  ;;  %v3481_v52 = vld [vmem:[%s6802_s22 + $0x20] sm:$0xff] }
 0x37e   : > { %v2762_v55 = vadd.f32 %v2761_v57, %v6332_v4  ;;  %v2763_v56 = vpop.f32.mrb[87].mxu1  ;;  %v3025_v60 = vmax.f32 %v2758_v51, 0.0  ;;  %v3482_v51 = vld [vmem:[%s6802_s22 + $0x28] sm:$0xff] }
 0x37f   : > { %v2764_v58 = vadd.f32 %v2763_v56, %v6335_v27  ;;  %v3026_v1 = vmax.f32 %v2760_v53, 0.0 }
 0x380   : > { %v3028_v62 = vmax.f32 %v2762_v55, 0.0  ;;  %v5633_v55 = vld [vmem:[%s6800_s8 + $0x10] ss:$8 sps:$4 sm:$0xff]   ;;  %3520 = vperm.xlu1 %5509, %v3482_v51  }
 0x381   : > { %v3029_v6 = vmax.f32 %v2764_v58, 0.0 }
 0x382   : > { %v3056_v7 = vpack.c.bf16 %v3028_v62, %v3025_v60  ;;  %v5636_v60 = vld [vmem:[%s6800_s8 + $0x24] ss:$8 sps:$4 sm:$0xff]  }
 0x383   : > { %v4734_v9 = vpack.c.bf16 %v3029_v6, %v3026_v1  ;;  %v2767_v10 = vpop.f32.mrb[88].mxu1 }
 0x384   : > { %v2768_v12 = vadd.f32 %v2767_v10, %v6332_v4  ;;  %v2769_v14 = vpop.f32.mrb[89].mxu1  ;;  %4986 = vmatprep.subr.bf16.mxu1 %v3056_v7  ;;  %v3484_v7 = vld [vmem:[%s6802_s22 + $0x38] sm:$0xff] }
 0x385   : > { %4765 = vst [vmem:[#allocation2 + $0x68] sm:$0xff] %v4734_v9   ;;  %v2770_v15 = vadd.f32 %v2769_v14, %v6335_v27  ;;  %v2771_v17 = vpop.f32.mrb[90].mxu1  ;;  %4987 = vmatpush3.bf16.msra.mxu1 %v6371_v61  ;;  %v3483_v9 = vld [vmem:[%s6802_s22 + $0x30] sm:$0xff]  ;;  %3530 = vperm.xlu1 %5509, %v3484_v7  }
 0x386   : > { %v2772_v31 = vadd.f32 %v2771_v17, %v6332_v4  ;;  %v2773_v16 = vpop.f32.mrb[91].mxu1  ;;  %v3031_v21 = vmax.f32 %v2768_v12, 0.0 }
 0x387   : > { %v2774_v19 = vadd.f32 %v2773_v16, %v6335_v27  ;;  %v3032_v25 = vmax.f32 %v2770_v15, 0.0 }
 0x388   : > { %v3034_v22 = vmax.f32 %v2772_v31, 0.0 }
 0x389   : > { %v3035_v33 = vmax.f32 %v2774_v19, 0.0  ;;  %v3486_v19 = vld [vmem:[%s6802_s22 + $0x48] sm:$0xff] }
 0x38a   : > { %v3057_v35 = vpack.c.bf16 %v3034_v22, %v3031_v21  ;;  %v3485_v21 = vld [vmem:[%s6802_s22 + $0x40] sm:$0xff]  ;;  %3540 = vperm.xlu1 %5509, %v3486_v19  }
 0x38b   : > { %v4739_v37 = vpack.c.bf16 %v3035_v33, %v3032_v25  ;;  %v2777_v38 = vpop.f32.mrb[92].mxu1  ;;  %v5639_v33 = vld [vmem:[%s6800_s8 + $0x20] ss:$8 sps:$4 sm:$0xff]  }
 0x38c   : > { %v2778_v40 = vadd.f32 %v2777_v38, %v6332_v4  ;;  %v2779_v42 = vpop.f32.mrb[93].mxu1  ;;  %4988 = vmatprep.subr.bf16.mxu1 %v3057_v35  ;;  %v5642_v38 = vld [vmem:[%s6800_s8 + $0x34] ss:$8 sps:$4 sm:$0xff]  }
 0x38d   : > { %4766 = vst [vmem:[#allocation2 + $0x70] sm:$0xff] %v4739_v37   ;;  %v2780_v61 = vadd.f32 %v2779_v42, %v6335_v27  ;;  %v2781_v44 = vpop.f32.mrb[94].mxu1  ;;  %4989 = vmatpush3.bf16.msra.mxu1 %v6377_v24 }
 0x38e   : > { %v2782_v5 = vadd.f32 %v2781_v44, %v6332_v4  ;;  %v2783_v47 = vpop.f32.mrb[95].mxu1  ;;  %v3037_v36 = vmax.f32 %v2778_v40, 0.0  ;;  %v5625_v4 = vld [vmem:[%s6800_s8] ss:$8 sps:$4 sm:$0xff]   ;;  %v3487_v44 = vld [vmem:[%s6802_s22 + $0x50] sm:$0xff] }
 0x38f   : > { %v2784_v48 = vadd.f32 %v2783_v47, %v6335_v27  ;;  %v3038_v63 = vmax.f32 %v2780_v61, 0.0  ;;  %v3488_v61 = vld [vmem:[%s6802_s22 + $0x58] sm:$0xff] }
 0x390   : > { %v3040_v39 = vmax.f32 %v2782_v5, 0.0  ;;  %3550 = vperm.xlu1 %5509, %v3488_v61  }
 0x391   : > { %v3041_v46 = vmax.f32 %v2784_v48, 0.0 }
 0x392   : > { %v3058_v26 = vpack.c.bf16 %v3040_v39, %v3037_v36 }
 0x393   : > { %v4744_v54 = vpack.c.bf16 %v3041_v46, %v3038_v63  ;;  %v5330_v2 = vpop.f32.mrb[96].mxu1 }
 0x394   : > { %v2829_v29 = vadd.f32 %v5330_v2, %v6432_v59  ;;  %v2820_v45 = vpop.f32.mrb[97].mxu1  ;;  %4990 = vmatprep.subr.bf16.mxu1 %v3058_v26  ;;  %v3490_v26 = vld [vmem:[%s6802_s22 + $0x68] sm:$0xff] }
 0x395   : > { %4767 = vst [vmem:[#allocation2 + $0x78] sm:$0xff] %v4744_v54   ;;  %v2821_v27 = vadd.f32 %v2820_v45, %v6432_v59  ;;  %v5331_v24 = vpop.f32.mrb[98].mxu1  ;;  %4991 = vmatpush3.bf16.msra.mxu1 %v6383_v41  ;;  %v3478_v41 = vld [vmem:[%s6802_s22 + $0x8] sm:$0xff]  ;;  %v3489_v54 = vld [vmem:[%s6802_s22 + $0x60] sm:$0xff]  ;;  %v5645_v45 = vld [vmem:[%s6800_s8 + $0x30] ss:$8 sps:$4 sm:$0xff]   ;;  %3560 = vperm.xlu1 %5509, %v3490_v26  }
 0x396   : > { %v2832_v30 = vadd.f32 %v5331_v24, %v6432_v59  ;;  %v2823_v3 = vpop.f32.mrb[99].mxu1  ;;  %v2955_v13 = vmax.f32 %v2829_v29, 0.0  ;;  %3500 = vperm.xlu0 %5508, %v3478_v41   ;;  %v5648_v24 = vld [vmem:[%s6800_s8 + $0x44] ss:$8 sps:$4 sm:$0xff]  }
 0x397   : > { %v2824_v8 = vadd.f32 %v2823_v3, %v6432_v59  ;;  %v2949_v20 = vmax.f32 %v2821_v27, 0.0  ;;  %v3491_v3 = vld [vmem:[%s6802_s22 + $0x70] sm:$0xff] }
 0x398   : > { %v2958_v18 = vmax.f32 %v2832_v30, 0.0  ;;  %3413 = vmatmul.mubr.bf16.vlgmr.msra.gmra.mrb[128].mxu1 %v5625_v4  ;;  %v3492_v30 = vld [vmem:[%s6802_s22 + $0x78] sm:$0xff] }
 0x399   : > { %v2952_v23 = vmax.f32 %v2824_v8, 0.0  ;;  %3420 = vmatprep.mubr.bf16.mxu1 %v5630_v28  ;;  %3570 = vperm.xlu1 %5509, %v3492_v30  }
 0x39a   : > { %v6457_v32 = vpack.c.bf16 %v2958_v18, %v2955_v13  ;;  %3515 = vperm.xlu0 %5508, %v3481_v52   ;;  %v5651_v52 = vld [vmem:[%s6800_s8 + $0x40] ss:$8 sps:$4 sm:$0xff]  }
 0x39b   : > { %v6459_v34 = vpack.c.bf16 %v2952_v23, %v2949_v20  ;;  %v5334_v50 = vpop.f32.mrb[100].mxu1 }
 0x39c   : > { %v2845_v53 = vadd.f32 %v5334_v50, %v6432_v59  ;;  %v2836_v57 = vpop.f32.mrb[101].mxu1 }
 0x39d   : > { %v2837_v56 = vadd.f32 %v2836_v57, %v6432_v59  ;;  %v5335_v58 = vpop.f32.mrb[102].mxu1 }
 0x39e   : > { %v2848_v62 = vadd.f32 %v5335_v58, %v6432_v59  ;;  %v2839_v1 = vpop.f32.mrb[103].mxu1  ;;  %v2967_v10 = vmax.f32 %v2845_v53, 0.0  ;;  %3525 = vperm.xlu0 %5508, %v3483_v9  }
 0x39f   : > { %v2840_v6 = vadd.f32 %v2839_v1, %v6432_v59  ;;  %v2961_v14 = vmax.f32 %v2837_v56, 0.0 }
 0x3a0   : > { %v2970_v12 = vmax.f32 %v2848_v62, 0.0  ;;  %3421 = vmatmul.mubr.bf16.gmra.mrb[132].mxu1 %v5633_v55  ;;  %v5654_v55 = vld [vmem:[%s6800_s8 + $0x54] ss:$8 sps:$4 sm:$0xff]  }
 0x3a1   : > { %v2964_v15 = vmax.f32 %v2840_v6, 0.0  ;;  %3428 = vmatprep.mubr.bf16.mxu1 %v5636_v60 }
 0x3a2   : > { %v6483_v17 = vpack.c.bf16 %v2970_v12, %v2967_v10  ;;  %3535 = vperm.xlu0 %5508, %v3485_v21  }
 0x3a3   : > { %v6485_v31 = vpack.c.bf16 %v2964_v15, %v2961_v14  ;;  %v5338_v16 = vpop.f32.mrb[104].mxu1 }
 0x3a4   : > { %v2861_v22 = vadd.f32 %v5338_v16, %v6432_v59  ;;  %v2852_v25 = vpop.f32.mrb[105].mxu1  ;;  %v5657_v16 = vld [vmem:[%s6800_s8 + $0x50] ss:$8 sps:$4 sm:$0xff]  }
 0x3a5   : > { %v2853_v35 = vadd.f32 %v2852_v25, %v6432_v59  ;;  %v5339_v37 = vpop.f32.mrb[106].mxu1 }
 0x3a6   : > { %v2864_v40 = vadd.f32 %v5339_v37, %v6432_v59  ;;  %v2855_v42 = vpop.f32.mrb[107].mxu1  ;;  %v2979_v5 = vmax.f32 %v2861_v22, 0.0  ;;  %3545 = vperm.xlu0 %5508, %v3487_v44   ;;  %v5660_v22 = vld [vmem:[%s6800_s8 + $0x64] ss:$8 sps:$4 sm:$0xff]  }
 0x3a7   : > { %v2856_v43 = vadd.f32 %v2855_v42, %v6432_v59  ;;  %v2973_v48 = vmax.f32 %v2853_v35, 0.0 }
 0x3a8   : > { %v2982_v47 = vmax.f32 %v2864_v40, 0.0  ;;  %3429 = vmatmul.mubr.bf16.gmra.mrb[136].mxu1 %v5639_v33 }
 0x3a9   : > { %v2976_v36 = vmax.f32 %v2856_v43, 0.0  ;;  %3436 = vmatprep.mubr.bf16.mxu1 %v5642_v38 }
 0x3aa   : > { %v6509_v39 = vpack.c.bf16 %v2982_v47, %v2979_v5  ;;  %3555 = vperm.xlu0 %5508, %v3489_v54  }
 0x3ab   : > { %v6511_v63 = vpack.c.bf16 %v2976_v36, %v2973_v48  ;;  %v5342_v46 = vpop.f32.mrb[108].mxu1 }
 0x3ac   : > { %v2877_v2 = vadd.f32 %v5342_v46, %v6432_v59  ;;  %v2868_v29 = vpop.f32.mrb[109].mxu1  ;;  %v5666_v46 = vld [vmem:[%s6800_s8 + $0x74] ss:$8 sps:$4 sm:$0xff]  }
 0x3ad   : > { %v2869_v4 = vadd.f32 %v2868_v29, %v6432_v59  ;;  %v5343_v27 = vpop.f32.mrb[110].mxu1 }
 0x3ae   : > { %v2880_v28 = vadd.f32 %v5343_v27, %v6432_v59  ;;  %v2871_v49 = vpop.f32.mrb[111].mxu1  ;;  %v2991_v8 = vmax.f32 %v2877_v2, 0.0  ;;  %3565 = vperm.xlu0 %5508, %v3491_v3  }
 0x3af   : > { %v2872_v0 = vadd.f32 %v2871_v49, %v6432_v59  ;;  %v2985_v11 = vmax.f32 %v2869_v4, 0.0 }
 0x3b0   : > { %v2994_v41 = vmax.f32 %v2880_v28, 0.0  ;;  %3437 = vmatmul.mubr.bf16.gmra.mrb[140].mxu1 %v5645_v45 }
 0x3b1   : > { %v2988_v13 = vmax.f32 %v2872_v0, 0.0  ;;  %3444 = vmatprep.mubr.bf16.mxu1 %v5648_v24 }
 0x3b2   : > { %v6535_v18 = vpack.c.bf16 %v2994_v41, %v2991_v8 }
 0x3b3   : > { %v6537_v20 = vpack.c.bf16 %v2988_v13, %v2985_v11  ;;  %v5346_v23 = vpop.f32.mrb[112].mxu1 }
 0x3b4   : > { %v2893_v50 = vadd.f32 %v5346_v23, %v6432_v59  ;;  %v2884_v51 = vpop.f32.mrb[113].mxu1 }
 0x3b5   : > { %v2885_v53 = vadd.f32 %v2884_v51, %v6432_v59  ;;  %v5347_v57 = vpop.f32.mrb[114].mxu1 }
 0x3b6   : > { %v2896_v56 = vadd.f32 %v5347_v57, %v6432_v59  ;;  %v2887_v58 = vpop.f32.mrb[115].mxu1  ;;  %v3003_v62 = vmax.f32 %v2893_v50, 0.0  ;;  %v5671_v57 = vld [vmem:[%s5862_s19 + $0x8] sm:$0xff]  }
 0x3b7   : > { %v2888_v60 = vadd.f32 %v2887_v58, %v6432_v59  ;;  %v2997_v6 = vmax.f32 %v2885_v53, 0.0  ;;  %v5628_v53 = vld [vmem:[%s6801_s9 + $0x14] ss:$8 sps:$4 sm:$0xff]  }
 0x3b8   : > { %v3006_v1 = vmax.f32 %v2896_v56, 0.0  ;;  %3445 = vmatmul.mubr.bf16.gmra.mrb[144].mxu1 %v5651_v52  ;;  %v5638_v56 = vld [vmem:[%s6801_s9 + $0x20] ss:$8 sps:$4 sm:$0xff]   ;;  %v5640_v58 = vld [vmem:[%s6801_s9 + $0x34] ss:$8 sps:$4 sm:$0xff]  }
 0x3b9   : > { %v3000_v7 = vmax.f32 %v2888_v60, 0.0  ;;  %3452 = vmatprep.mubr.bf16.mxu1 %v5654_v55  ;;  %v5634_v55 = vld [vmem:[%s6801_s9 + $0x24] ss:$8 sps:$4 sm:$0xff]   ;;  %v5644_v60 = vld [vmem:[%s6801_s9 + $0x30] ss:$8 sps:$4 sm:$0xff]  }
 0x3ba   : > { %v3084_v9 = vpack.c.bf16 %v3006_v1, %v3003_v62  ;;  %v5646_v62 = vld [vmem:[%s6801_s9 + $0x44] ss:$8 sps:$4 sm:$0xff]   ;;  %v5650_v1 = vld [vmem:[%s6801_s9 + $0x40] ss:$8 sps:$4 sm:$0xff]  }
 0x3bb   : > { %v3083_v10 = vpack.c.bf16 %v3000_v7, %v2997_v6  ;;  %v5350_v12 = vpop.f32.mrb[116].mxu1  ;;  %v5652_v6 = vld [vmem:[%s6801_s9 + $0x54] ss:$8 sps:$4 sm:$0xff]   ;;  %v5656_v7 = vld [vmem:[%s6801_s9 + $0x50] ss:$8 sps:$4 sm:$0xff]  }
 0x3bc   : > { %v2909_v14 = vadd.f32 %v5350_v12, %v6432_v59  ;;  %v2900_v15 = vpop.f32.mrb[117].mxu1  ;;  %v5664_v12 = vld [vmem:[%s6801_s9 + $0x74] ss:$8 sps:$4 sm:$0xff]  }
 0x3bd   : > { %v2901_v19 = vadd.f32 %v2900_v15, %v6432_v59  ;;  %v5351_v21 = vpop.f32.mrb[118].mxu1  ;;  %4912 = vmatprep.subr.bf16.mxu0 %v3083_v10  ;;  %v5662_v10 = vld [vmem:[%s6801_s9 + $0x60] ss:$8 sps:$4 sm:$0xff]  }
 0x3be   : > { %v2912_v25 = vadd.f32 %v5351_v21, %v6432_v59  ;;  %v2903_v33 = vpop.f32.mrb[119].mxu1  ;;  %4913 = vmatpush3.bf16.msra.mxu0 %v6459_v34  ;;  %v3015_v37 = vmax.f32 %v2909_v14, 0.0  ;;  %v5663_v34 = vld [vmem:[%s6800_s8 + $0x60] ss:$8 sps:$4 sm:$0xff]   ;;  %v5668_v14 = vld [vmem:[%s6801_s9 + $0x70] ss:$8 sps:$4 sm:$0xff]  }
 0x3bf   : > { %v2904_v35 = vadd.f32 %v2903_v33, %v6432_v59  ;;  %4914 = vmatprep.subr.bf16.mxu0 %v3084_v9  ;;  %v3009_v40 = vmax.f32 %v2901_v19, 0.0  ;;  %v5658_v9 = vld [vmem:[%s6801_s9 + $0x64] ss:$8 sps:$4 sm:$0xff]   ;;  %v5676_v19 = vld [vmem:[%s5862_s19 + $0x30] sm:$0xff]   ;;  %v5677_v21 = vld [vmem:[%s5862_s19 + $0x38] sm:$0xff]  }
 0x3c0   : > { %v3018_v38 = vmax.f32 %v2912_v25, 0.0  ;;  %3453 = vmatmul.mubr.bf16.gmra.mrb[148].mxu1 %v5657_v16  ;;  %v5674_v15 = vld [vmem:[%s5862_s19 + $0x20] sm:$0xff]   ;;  %v5675_v16 = vld [vmem:[%s5862_s19 + $0x28] sm:$0xff]  }
 0x3c1   : > { %v3012_v42 = vmax.f32 %v2904_v35, 0.0  ;;  %3460 = vmatprep.mubr.bf16.mxu1 %v5660_v22 }
 0x3c2   : > { %v3086_v43 = vpack.c.bf16 %v3018_v38, %v3015_v37  ;;  %4915 = vmatpush3.bf16.msra.mxu0 %v6457_v32 }
 0x3c3   : > { %v3085_v61 = vpack.c.bf16 %v3012_v42, %v3009_v40  ;;  %v5354_v44 = vpop.f32.mrb[120].mxu1 }
 0x3c4   : > { %v2925_v5 = vadd.f32 %v5354_v44, %v6432_v59  ;;  %v2916_v47 = vpop.f32.mrb[121].mxu1 }
 0x3c5   : > { %v2917_v48 = vadd.f32 %v2916_v47, %v6432_v59  ;;  %v5355_v36 = vpop.f32.mrb[122].mxu1  ;;  %4916 = vmatprep.subr.bf16.mxu0 %v3085_v61  ;;  %v5679_v61 = vld [vmem:[%s5881_s3 + $0x8] sm:$0xff]  }
 0x3c6   : > { %v2928_v26 = vadd.f32 %v5355_v36, %v6432_v59  ;;  %v2919_v32 = vpop.f32.mrb[123].mxu1  ;;  %4917 = vmatpush3.bf16.msra.mxu0 %v6485_v31  ;;  %v3027_v2 = vmax.f32 %v2925_v5, 0.0  ;;  %v5669_v31 = vld [vmem:[%s6800_s8 + $0x70] ss:$8 sps:$4 sm:$0xff]  }
 0x3c7   : > { %v2920_v54 = vadd.f32 %v2919_v32, %v6432_v59  ;;  %4918 = vmatprep.subr.bf16.mxu0 %v3086_v43  ;;  %v3021_v45 = vmax.f32 %v2917_v48, 0.0  ;;  %v5678_v43 = vld [vmem:[%s5881_s3] sm:$0xff]   ;;  %v5680_v48 = vld [vmem:[%s5881_s3 + $0x10] sm:$0xff]  }
 0x3c8   : > { %v3030_v29 = vmax.f32 %v2928_v26, 0.0  ;;  %3461 = vmatmul.mubr.bf16.gmra.mrb[152].mxu1 %v5663_v34  ;;  %5392 = vmatprep.subr.bf16.mxu1 %v5678_v43  ;;  %v5681_v26 = vld [vmem:[%s5881_s3 + $0x18] sm:$0xff]  }
 0x3c9   : > { %v3024_v4 = vmax.f32 %v2920_v54, 0.0  ;;  %3468 = vmatprep.mubr.bf16.mxu1 %v5666_v46  ;;  %5393 = vmatpush3.bf16.msra.mxu1 %v5678_v43 }
 0x3ca   : > { %v3088_v27 = vpack.c.bf16 %v3030_v29, %v3027_v2  ;;  %4919 = vmatpush3.bf16.msra.mxu0 %v6483_v17  ;;  %5394 = vmatprep.subr.bf16.mxu1 %v5679_v61 }
 0x3cb   : > { %v3087_v24 = vpack.c.bf16 %v3024_v4, %v3021_v45  ;;  %v5358_v28 = vpop.f32.mrb[124].mxu1  ;;  %v5682_v45 = vld [vmem:[%s5881_s3 + $0x20] sm:$0xff]  }
 0x3cc   : > { %v2941_v49 = vadd.f32 %v5358_v28, %v6432_v59  ;;  %v2932_v0 = vpop.f32.mrb[125].mxu1 }
 0x3cd   : > { %v2933_v30 = vadd.f32 %v2932_v0, %v6432_v59  ;;  %v5359_v3 = vpop.f32.mrb[126].mxu1  ;;  %4920 = vmatprep.subr.bf16.mxu0 %v3087_v24  ;;  %5395 = vmatpush3.bf16.msra.mxu1 %v5679_v61  ;;  %v5683_v24 = vld [vmem:[%s5881_s3 + $0x28] sm:$0xff]  }
 0x3ce   : > { %v2944_v8 = vadd.f32 %v5359_v3, %v6432_v59  ;;  %v2935_v41 = vpop.f32.mrb[127].mxu1  ;;  %4921 = vmatpush3.bf16.msra.mxu0 %v6511_v63  ;;  %v3039_v11 = vmax.f32 %v2941_v49, 0.0  ;;  %v5670_v63 = vld [vmem:[%s5862_s19] sm:$0xff]   ;;  %5396 = vmatprep.subr.bf16.mxu1 %v5680_v48 }
 0x3cf   : > { %v2936_v17 = vadd.f32 %v2935_v41, %v6432_v59  ;;  %4922 = vmatprep.subr.bf16.mxu0 %v3088_v27  ;;  %v3033_v23 = vmax.f32 %v2933_v30, 0.0  ;;  %v5622_v59 = vld [vmem:[%s6801_s9] ss:$8 sps:$4 sm:$0xff]  }
 0x3d0   : > { %v3042_v13 = vmax.f32 %v2944_v8, 0.0  ;;  %3469 = vmatmul.mubr.bf16.gmra.mrb[156].mxu1 %v5669_v31 }
 0x3d1   : > { %v3036_v50 = vmax.f32 %v2936_v17, 0.0  ;;  %5397 = vmatpush3.bf16.msra.mxu1 %v5680_v48 }
 0x3d2   : > { %v3090_v51 = vpack.c.bf16 %v3042_v13, %v3039_v11  ;;  %4923 = vmatpush3.bf16.msra.mxu0 %v6509_v39  ;;  %v5672_v39 = vld [vmem:[%s5862_s19 + $0x10] sm:$0xff]   ;;  %5398 = vmatprep.subr.bf16.mxu1 %v5681_v26 }
 0x3d3   : > { %v3089_v52 = vpack.c.bf16 %v3036_v50, %v3033_v23 }
 0x3d5   : > { %4924 = vmatprep.subr.bf16.mxu0 %v3089_v52  ;;  %5399 = vmatpush3.bf16.msra.mxu1 %v5681_v26 }
 0x3d6   : > { %4925 = vmatpush3.bf16.msra.mxu0 %v6537_v20  ;;  %v5632_v20 = vld [vmem:[%s6801_s9 + $0x10] ss:$8 sps:$4 sm:$0xff]   ;;  %5400 = vmatprep.subr.bf16.mxu1 %v5682_v45 }
 0x3d7   : > { %4926 = vmatprep.subr.bf16.mxu0 %v3090_v51 }
 0x3d9   : > { %5401 = vmatpush3.bf16.msra.mxu1 %v5682_v45 }
 0x3da   : > { %4927 = vmatpush3.bf16.msra.mxu0 %v6535_v18  ;;  %v5673_v18 = vld [vmem:[%s5862_s19 + $0x18] sm:$0xff]   ;;  %5402 = vmatprep.subr.bf16.mxu1 %v5683_v24 }
 0x3db   : > { %5360 = vmatprep.subr.bf16.mxu0 %v5670_v63 }
 0x3dd   : > { %3236 = vmatmul.mubr.bf16.vlgmr.msra.gmra.mrb[64].mxu0 %v5622_v59  ;;  %5403 = vmatpush3.bf16.msra.mxu1 %v5683_v24 }
 0x3de   : > { %3243 = vmatprep.mubr.bf16.mxu0 %v5628_v53  ;;  %5361 = vmatpush3.bf16.msra.mxu0 %v5670_v63 }
 0x3df   : > { %5362 = vmatprep.subr.bf16.mxu0 %v5671_v57 }
 0x3e2   : > { %5363 = vmatpush3.bf16.msra.mxu0 %v5671_v57 }
 0x3e3   : > { %5364 = vmatprep.subr.bf16.mxu0 %v5672_v39 }
 0x3e5   : > { %3244 = vmatmul.mubr.bf16.gmra.mrb[68].mxu0 %v5632_v20 }
 0x3e6   : > { %3251 = vmatprep.mubr.bf16.mxu0 %v5634_v55  ;;  %5365 = vmatpush3.bf16.msra.mxu0 %v5672_v39 }
 0x3e7   : > { %5366 = vmatprep.subr.bf16.mxu0 %v5673_v18 }
 0x3ea   : > { %5367 = vmatpush3.bf16.msra.mxu0 %v5673_v18 }
 0x3eb   : > { %5368 = vmatprep.subr.bf16.mxu0 %v5674_v15 }
 0x3ed   : > { %3252 = vmatmul.mubr.bf16.gmra.mrb[72].mxu0 %v5638_v56 }
 0x3ee   : > { %3259 = vmatprep.mubr.bf16.mxu0 %v5640_v58  ;;  %5369 = vmatpush3.bf16.msra.mxu0 %v5674_v15 }
 0x3ef   : > { %5370 = vmatprep.subr.bf16.mxu0 %v5675_v16 }
 0x3f2   : > { %5371 = vmatpush3.bf16.msra.mxu0 %v5675_v16 }
 0x3f3   : > { %5372 = vmatprep.subr.bf16.mxu0 %v5676_v19 }
 0x3f5   : > { %3260 = vmatmul.mubr.bf16.gmra.mrb[76].mxu0 %v5644_v60 }
 0x3f6   : > { %3267 = vmatprep.mubr.bf16.mxu0 %v5646_v62  ;;  %5373 = vmatpush3.bf16.msra.mxu0 %v5676_v19 }
 0x3f7   : > { %5374 = vmatprep.subr.bf16.mxu0 %v5677_v21 }
 0x3fa   : > { %5375 = vmatpush3.bf16.msra.mxu0 %v5677_v21 }
 0x3fd   : > { %3268 = vmatmul.mubr.bf16.gmra.mrb[80].mxu0 %v5650_v1 }
 0x3fe   : > { %3275 = vmatprep.mubr.bf16.mxu0 %v5652_v6  ;;  %v3496_v6 = vpop.permute.xlu0 %3495 }
 0x405   : > { %3276 = vmatmul.mubr.bf16.gmra.mrb[84].mxu0 %v5656_v7 }
 0x406   : > { %3283 = vmatprep.mubr.bf16.mxu0 %v5658_v9 }
 0x40d   : > { %3284 = vmatmul.mubr.bf16.gmra.mrb[88].mxu0 %v5662_v10 }
 0x40e   : > { %3291 = vmatprep.mubr.bf16.mxu0 %v5664_v12 }
 0x415   : > { %3292 = vmatmul.mubr.bf16.gmra.mrb[92].mxu0 %v5668_v14  ;;  %v3501_v19 = vpop.permute.xlu0 %3500 }
 0x46b   : > { %v4992_v22 = vpop.f32.mrb[128].mxu1 }
 0x46c   : > { %v4993_v25 = vpop.f32.mrb[129].mxu1 }
 0x46d   : > { %v6637_v33 = vadd.f32 %v4993_v25, %v4992_v22  ;;  %v4995_v35 = vpop.f32.mrb[130].mxu1 }
 0x46e   : > { %v4996_v37 = vpop.f32.mrb[131].mxu1 }
 0x46f   : > { %v6639_v38 = vadd.f32 %v4996_v37, %v4995_v35 }
 0x473   : > { %v4998_v40 = vpop.f32.mrb[132].mxu1 }
 0x474   : > { %v4999_v42 = vpop.f32.mrb[133].mxu1 }
 0x475   : > { %v6643_v44 = vadd.f32 %v4999_v42, %v4998_v40  ;;  %v5001_v5 = vpop.f32.mrb[134].mxu1  ;;  %v3506_v40 = vpop.permute.xlu1 %3505 }
 0x476   : > { %v5002_v47 = vpop.f32.mrb[135].mxu1 }
 0x477   : > { %v6645_v34 = vadd.f32 %v5002_v47, %v5001_v5 }
 0x47b   : > { %v5004_v36 = vpop.f32.mrb[136].mxu1 }
 0x47c   : > { %v5005_v46 = vpop.f32.mrb[137].mxu1 }
 0x47d   : > { %v6649_v32 = vadd.f32 %v5005_v46, %v5004_v36  ;;  %v5007_v54 = vpop.f32.mrb[138].mxu1  ;;  %v3511_v46 = vpop.permute.xlu1 %3510 }
 0x47e   : > { %v5008_v2 = vpop.f32.mrb[139].mxu1 }
 0x47f   : > { %v6651_v29 = vadd.f32 %v5008_v2, %v5007_v54 }
 0x483   : > { %v5010_v4 = vpop.f32.mrb[140].mxu1 }
 0x484   : > { %v5011_v27 = vpop.f32.mrb[141].mxu1 }
 0x485   : > { %v6655_v28 = vadd.f32 %v5011_v27, %v5010_v4  ;;  %v5013_v49 = vpop.f32.mrb[142].mxu1 }
 0x486   : > { %v5014_v0 = vpop.f32.mrb[143].mxu1 }
 0x487   : > { %v6657_v31 = vadd.f32 %v5014_v0, %v5013_v49 }
 0x48b   : > { %v5016_v30 = vpop.f32.mrb[144].mxu1 }
 0x48c   : > { %v5017_v3 = vpop.f32.mrb[145].mxu1 }
 0x48d   : > { %v6659_v8 = vadd.f32 %v5017_v3, %v5016_v30  ;;  %v5019_v41 = vpop.f32.mrb[146].mxu1  ;;  %v3516_v30 = vpop.permute.xlu0 %3515 }
 0x48e   : > { %v5020_v17 = vpop.f32.mrb[147].mxu1 }
 0x48f   : > { %v6661_v11 = vadd.f32 %v5020_v17, %v5019_v41 }
 0x493   : > { %v5022_v13 = vpop.f32.mrb[148].mxu1 }
 0x494   : > { %v5023_v23 = vpop.f32.mrb[149].mxu1 }
 0x495   : > { %v6663_v50 = vadd.f32 %v5023_v23, %v5022_v13  ;;  %v5025_v51 = vpop.f32.mrb[150].mxu1 }
 0x496   : > { %v5026_v52 = vpop.f32.mrb[151].mxu1 }
 0x497   : > { %v6665_v63 = vadd.f32 %v5026_v52, %v5025_v51 }
 0x49b   : > { %v5028_v59 = vpop.f32.mrb[152].mxu1 }
 0x49c   : > { %v5029_v53 = vpop.f32.mrb[153].mxu1 }
 0x49d   : > { %v6667_v57 = vadd.f32 %v5029_v53, %v5028_v59  ;;  %v5031_v39 = vpop.f32.mrb[154].mxu1 }
 0x49e   : > { %v5032_v20 = vpop.f32.mrb[155].mxu1 }
 0x49f   : > { %v6669_v55 = vadd.f32 %v5032_v20, %v5031_v39  ;;  %v3526_v20 = vpop.permute.xlu0 %3525 }
 0x4a3   : > { %v5034_v18 = vpop.f32.mrb[156].mxu1 }
 0x4a4   : > { %v5035_v56 = vpop.f32.mrb[157].mxu1 }
 0x4a5   : > { %v6671_v58 = vadd.f32 %v5035_v56, %v5034_v18  ;;  %v5037_v60 = vpop.f32.mrb[158].mxu1 }
 0x4a6   : > { %v5038_v62 = vpop.f32.mrb[159].mxu1 }
 0x4a7   : > { %v6673_v1 = vadd.f32 %v5038_v62, %v5037_v60 }
 0x4b0   : > { %v4928_v7 = vpop.f32.mrb[64].mxu0 }
 0x4b1   : > { %v4929_v9 = vpop.f32.mrb[65].mxu0 }
 0x4b2   : > { %v4930_v10 = vadd.f32 %v4929_v9, %v4928_v7  ;;  %v4931_v12 = vpop.f32.mrb[66].mxu0 }
 0x4b3   : > { %v4932_v14 = vpop.f32.mrb[67].mxu0 }
 0x4b4   : > { %v4933_v15 = vadd.f32 %v4932_v14, %v4931_v12  ;;  %v3415_v16 = vadd.f32 %v6637_v33, %v4930_v10 }
 0x4b6   : > { %v3418_v21 = vadd.f32 %v6639_v38, %v4933_v15  ;;  %v3573_v25 = vmul.f32 %v3496_v6, %v3415_v16  ;;  %v3536_v15 = vpop.permute.xlu0 %3535 }
 0x4b8   : > { %v4934_v22 = vpop.f32.mrb[68].mxu0  ;;  %v3574_v35 = vmul.f32 %v3501_v19, %v3418_v21 }
 0x4b9   : > { %v4935_v37 = vpop.f32.mrb[69].mxu0 }
 0x4ba   : > { %v4936_v42 = vadd.f32 %v4935_v37, %v4934_v22  ;;  %v4937_v43 = vpop.f32.mrb[70].mxu0  ;;  %v3589_v61 = vpack.c.bf16 %v3574_v35, %v3573_v25 }
 0x4bb   : > { %v4938_v5 = vpop.f32.mrb[71].mxu0 }
 0x4bc   : > { %v3423_v47 = vadd.f32 %v6643_v44, %v4936_v42  ;;  %v4939_v48 = vadd.f32 %v4938_v5, %v4937_v43  ;;  %5376 = vmatprep.mubr.bf16.mxu0 %v3589_v61  ;;  %v3521_v44 = vpop.permute.xlu1 %3520  ;;  %v3546_v61 = vpop.permute.xlu0 %3545 }
 0x4be   : > { %v3426_v36 = vadd.f32 %v6645_v34, %v4939_v48  ;;  %v3575_v33 = vmul.f32 %v3506_v40, %v3423_v47 }
 0x4c0   : > { %v4940_v26 = vpop.f32.mrb[72].mxu0  ;;  %v3576_v54 = vmul.f32 %v3511_v46, %v3426_v36 }
 0x4c1   : > { %v4941_v38 = vpop.f32.mrb[73].mxu0 }
 0x4c2   : > { %v4942_v2 = vadd.f32 %v4941_v38, %v4940_v26  ;;  %v3590_v45 = vpack.c.bf16 %v3576_v54, %v3575_v33  ;;  %v4943_v4 = vpop.f32.mrb[74].mxu0 }
 0x4c3   : > { %v4944_v27 = vpop.f32.mrb[75].mxu0 }
 0x4c4   : > { %v4945_v24 = vadd.f32 %v4944_v27, %v4943_v4  ;;  %v3431_v49 = vadd.f32 %v6649_v32, %v4942_v2  ;;  %5377 = vmatmul.mubr.bf16.vlgmr.msra.gmra.mrb[96].mxu0 %v3590_v45  ;;  %v3531_v32 = vpop.permute.xlu1 %3530  ;;  %v3556_v45 = vpop.permute.xlu0 %3555 }
 0x4c6   : > { %v3434_v0 = vadd.f32 %v6651_v29, %v4945_v24  ;;  %v3577_v34 = vmul.f32 %v3516_v30, %v3431_v49 }
 0x4c8   : > { %v4946_v3 = vpop.f32.mrb[76].mxu0  ;;  %v3578_v41 = vmul.f32 %v3521_v44, %v3434_v0 }
 0x4c9   : > { %v4947_v17 = vpop.f32.mrb[77].mxu0 }
 0x4ca   : > { %v4948_v13 = vadd.f32 %v4947_v17, %v4946_v3  ;;  %v4949_v23 = vpop.f32.mrb[78].mxu0  ;;  %v3591_v51 = vpack.c.bf16 %v3578_v41, %v3577_v34  ;;  %v3566_v34 = vpop.permute.xlu0 %3565 }
 0x4cb   : > { %v4950_v52 = vpop.f32.mrb[79].mxu0 }
 0x4cc   : > { %v4951_v59 = vadd.f32 %v4950_v52, %v4949_v23  ;;  %v3439_v53 = vadd.f32 %v6655_v28, %v4948_v13  ;;  %5380 = vmatprep.mubr.bf16.mxu0 %v3591_v51  ;;  %v3541_v28 = vpop.permute.xlu1 %3540  ;;  %v5684_v51 = vld [vmem:[%s5881_s3 + $0x30] sm:$0xff]   ;;  %v5685_v52 = vld [vmem:[%s5881_s3 + $0x38] sm:$0xff]  }
 0x4cd   : > { %5404 = vmatprep.subr.bf16.mxu1 %v5684_v51 }
 0x4ce   : > { %v3442_v39 = vadd.f32 %v6657_v31, %v4951_v59  ;;  %v3579_v56 = vmul.f32 %v3526_v20, %v3439_v53  ;;  %5405 = vmatpush3.bf16.msra.mxu1 %v5684_v51 }
 0x4cf   : > { %5406 = vmatprep.subr.bf16.mxu1 %v5685_v52 }
 0x4d0   : > { %v4952_v18 = vpop.f32.mrb[80].mxu0  ;;  %v3580_v29 = vmul.f32 %v3531_v32, %v3442_v39 }
 0x4d1   : > { %v4953_v60 = vpop.f32.mrb[81].mxu0 }
 0x4d2   : > { %v4954_v62 = vadd.f32 %v4953_v60, %v4952_v18  ;;  %v4955_v6 = vpop.f32.mrb[82].mxu0  ;;  %v3592_v7 = vpack.c.bf16 %v3580_v29, %v3579_v56  ;;  %5407 = vmatpush3.bf16.msra.mxu1 %v5685_v52 }
 0x4d3   : > { %v4956_v9 = vpop.f32.mrb[83].mxu0 }
 0x4d4   : > { %v4957_v10 = vadd.f32 %v4956_v9, %v4955_v6  ;;  %v3447_v12 = vadd.f32 %v6659_v8, %v4954_v62  ;;  %5381 = vmatmul.mubr.bf16.gmra.mrb[100].mxu0 %v3592_v7  ;;  %v3551_v8 = vpop.permute.xlu1 %3550 }
 0x4d6   : > { %v3450_v14 = vadd.f32 %v6661_v11, %v4957_v10  ;;  %v3581_v19 = vmul.f32 %v3536_v15, %v3447_v12 }
 0x4d8   : > { %v4958_v16 = vpop.f32.mrb[84].mxu0  ;;  %v3582_v31 = vmul.f32 %v3541_v28, %v3450_v14 }
 0x4d9   : > { %v4959_v21 = vpop.f32.mrb[85].mxu0 }
 0x4da   : > { %v4960_v22 = vadd.f32 %v4959_v21, %v4958_v16  ;;  %v4961_v25 = vpop.f32.mrb[86].mxu0  ;;  %v3593_v35 = vpack.c.bf16 %v3582_v31, %v3581_v19 }
 0x4db   : > { %v4962_v37 = vpop.f32.mrb[87].mxu0 }
 0x4dc   : > { %v4963_v40 = vadd.f32 %v4962_v37, %v4961_v25  ;;  %v3455_v42 = vadd.f32 %v6663_v50, %v4960_v22  ;;  %5384 = vmatprep.mubr.bf16.mxu0 %v3593_v35  ;;  %v3561_v50 = vpop.permute.xlu1 %3560 }
 0x4de   : > { %v3458_v43 = vadd.f32 %v6665_v63, %v4963_v40  ;;  %v3583_v47 = vmul.f32 %v3546_v61, %v3455_v42 }
 0x4e0   : > { %v4964_v5 = vpop.f32.mrb[88].mxu0  ;;  %v3584_v11 = vmul.f32 %v3551_v8, %v3458_v43 }
 0x4e1   : > { %v4965_v48 = vpop.f32.mrb[89].mxu0 }
 0x4e2   : > { %v4966_v36 = vadd.f32 %v4965_v48, %v4964_v5  ;;  %v4967_v46 = vpop.f32.mrb[90].mxu0  ;;  %v3594_v33 = vpack.c.bf16 %v3584_v11, %v3583_v47 }
 0x4e3   : > { %v4968_v26 = vpop.f32.mrb[91].mxu0 }
 0x4e4   : > { %v4969_v54 = vadd.f32 %v4968_v26, %v4967_v46  ;;  %v3463_v38 = vadd.f32 %v6667_v57, %v4966_v36  ;;  %5385 = vmatmul.mubr.bf16.gmra.mrb[104].mxu0 %v3594_v33 }
 0x4e6   : > { %v3466_v2 = vadd.f32 %v6669_v55, %v4969_v54  ;;  %v3585_v27 = vmul.f32 %v3556_v45, %v3463_v38  ;;  %v3571_v55 = vpop.permute.xlu1 %3570 }
 0x4e8   : > { %v4970_v4 = vpop.f32.mrb[92].mxu0  ;;  %v3586_v63 = vmul.f32 %v3561_v50, %v3466_v2 }
 0x4e9   : > { %v4971_v24 = vpop.f32.mrb[93].mxu0 }
 0x4ea   : > { %v4972_v49 = vadd.f32 %v4971_v24, %v4970_v4  ;;  %v4973_v0 = vpop.f32.mrb[94].mxu0  ;;  %v3595_v44 = vpack.c.bf16 %v3586_v63, %v3585_v27 }
 0x4eb   : > { %v4974_v30 = vpop.f32.mrb[95].mxu0 }
 0x4ec   : > { %v4975_v3 = vadd.f32 %v4974_v30, %v4973_v0  ;;  %v3471_v41 = vadd.f32 %v6671_v58, %v4972_v49  ;;  %5388 = vmatprep.mubr.bf16.mxu0 %v3595_v44  ;;  %v4503_v58 = vld [vmem:[%s710_s7] ss:$0 sm:$0xff]  ;;  %s5725_s7 = smov [#allocation2]  }
 0x4ed   : > { %s4206_s3 = sshll.u32 %s5725_s7, 4  ;;  %s4207_s3 = int_to_ptr.vmem [resolvable:$true] %s4206_s3 }
 0x4ee   : > { %v3474_v57 = vadd.f32 %v6673_v1, %v4975_v3  ;;  %v3587_v13 = vmul.f32 %v3566_v34, %v3471_v41  ;;  %s5686_s26 = scalar_lea.vmem %s4207_s3, 2048  ;;  %p5693_p9 = scmp.lt.s32.totalorder %s4207_s3, %s4207_s3 }
 0x4ef   : > { %p5687_p6 = scmp.ne.s32.totalorder %s4207_s3, %s5686_s26  ;;  %p5694_p10 = scmp.lt.s32.totalorder %s5686_s26, %s5686_s26 }
 0x4f0   : > { %v3588_v17 = vmul.f32 %v3571_v55, %v3474_v57 }
 0x4f1   : > { %p5688_p7 = pnand %p5687_p6, %p5494_p5  ;;  %p5695_p11 = por %p5694_p10, %p5693_p9 }
 0x4f2   : > { %v3596_v23 = vpack.c.bf16 %v3588_v17, %v3587_v13 }
 0x4f3   : > { %p5689_p8 = pneg %p5688_p7 }
 0x4f4   : > { %5389 = vmatmul.mubr.bf16.gmra.mrb[108].mxu0 %v3596_v23 }
 0x4f5   : > { %p5696_p12 = pnand %p5695_p11, %p5689_p8 }
 0x597   : > { %v5378_v59 = vpop.f32.mrb[96].mxu0 }
 0x598   : > { %v3711_v53 = vadd.f32 %v5378_v59, %v4503_v58  ;;  %v3702_v1 = vpop.f32.mrb[97].mxu0 }
 0x599   : > { %v3703_v39 = vadd.f32 %v4503_v58, %v3702_v1  ;;  %v5379_v32 = vpop.f32.mrb[98].mxu0 }
 0x59a   : > { %v3714_v20 = vadd.f32 %v5379_v32, %v4503_v58  ;;  %v3705_v18 = vpop.f32.mrb[99].mxu0  ;;  %v3767_v56 = vmax.f32 %v3711_v53, 0.0 }
 0x59b   : > { %v3706_v29 = vadd.f32 %v4503_v58, %v3705_v18  ;;  %v3765_v62 = vmax.f32 %v3703_v39, 0.0 }
 0x59c   : > { %v3768_v60 = vmax.f32 %v3714_v20, 0.0 }
 0x59d   : > { %v3766_v6 = vmax.f32 %v3706_v29, 0.0 }
 0x59e   : > { %v3782_v7 = vpack.c.bf16 %v3768_v60, %v3767_v56 }
 0x59f   : > { %v3781_v9 = vpack.c.bf16 %v3766_v6, %v3765_v62 }
 0x5a1   : > { %5408 = vmatprep.mubr.bf16.mxu1 %v3781_v9 }
 0x5a2   : > { %5409 = vmatmul.mubr.bf16.vlgmr.msra.gmra.mrb[160].mxu1 %v3782_v7 }
 0x5a7   : > { %v5382_v10 = vpop.f32.mrb[100].mxu0 }
 0x5a8   : > { %v3727_v12 = vadd.f32 %v5382_v10, %v4503_v58  ;;  %v3718_v14 = vpop.f32.mrb[101].mxu0 }
 0x5a9   : > { %v3719_v28 = vadd.f32 %v4503_v58, %v3718_v14  ;;  %v5383_v15 = vpop.f32.mrb[102].mxu0 }
 0x5aa   : > { %v3730_v16 = vadd.f32 %v5383_v15, %v4503_v58  ;;  %v3721_v31 = vpop.f32.mrb[103].mxu0  ;;  %v3771_v21 = vmax.f32 %v3727_v12, 0.0 }
 0x5ab   : > { %v3722_v19 = vadd.f32 %v4503_v58, %v3721_v31  ;;  %v3769_v25 = vmax.f32 %v3719_v28, 0.0 }
 0x5ac   : > { %v3772_v22 = vmax.f32 %v3730_v16, 0.0 }
 0x5ad   : > { %v3770_v35 = vmax.f32 %v3722_v19, 0.0 }
 0x5ae   : > { %v3784_v37 = vpack.c.bf16 %v3772_v22, %v3771_v21 }
 0x5af   : > { %v3783_v40 = vpack.c.bf16 %v3770_v35, %v3769_v25 }
 0x5b1   : > { %5412 = vmatprep.mubr.bf16.mxu1 %v3783_v40 }
 0x5b2   : > { %5413 = vmatmul.mubr.bf16.gmra.mrb[164].mxu1 %v3784_v37 }
 0x5b7   : > { %v5386_v42 = vpop.f32.mrb[104].mxu0 }
 0x5b8   : > { %v3743_v43 = vadd.f32 %v5386_v42, %v4503_v58  ;;  %v3734_v8 = vpop.f32.mrb[105].mxu0 }
 0x5b9   : > { %v3735_v61 = vadd.f32 %v4503_v58, %v3734_v8  ;;  %v5387_v5 = vpop.f32.mrb[106].mxu0 }
 0x5ba   : > { %v3746_v11 = vadd.f32 %v5387_v5, %v4503_v58  ;;  %v3737_v47 = vpop.f32.mrb[107].mxu0  ;;  %v3775_v36 = vmax.f32 %v3743_v43, 0.0 }
 0x5bb   : > { %v3738_v48 = vadd.f32 %v4503_v58, %v3737_v47  ;;  %v3773_v33 = vmax.f32 %v3735_v61, 0.0 }
 0x5bc   : > { %v3776_v46 = vmax.f32 %v3746_v11, 0.0 }
 0x5bd   : > { %v3774_v26 = vmax.f32 %v3738_v48, 0.0 }
 0x5be   : > { %v3786_v54 = vpack.c.bf16 %v3776_v46, %v3775_v36 }
 0x5bf   : > { %v3785_v38 = vpack.c.bf16 %v3774_v26, %v3773_v33 }
 0x5c1   : > { %5416 = vmatprep.mubr.bf16.mxu1 %v3785_v38 }
 0x5c2   : > { %5417 = vmatmul.mubr.bf16.gmra.mrb[168].mxu1 %v3786_v54 }
 0x5c7   : > { %v5390_v2 = vpop.f32.mrb[108].mxu0 }
 0x5c8   : > { %v3759_v50 = vadd.f32 %v5390_v2, %v4503_v58  ;;  %v3750_v45 = vpop.f32.mrb[109].mxu0 }
 0x5c9   : > { %v3751_v4 = vadd.f32 %v4503_v58, %v3750_v45  ;;  %v5391_v63 = vpop.f32.mrb[110].mxu0 }
 0x5ca   : > { %v3762_v27 = vadd.f32 %v5391_v63, %v4503_v58  ;;  %v3753_v24 = vpop.f32.mrb[111].mxu0  ;;  %v3779_v0 = vmax.f32 %v3759_v50, 0.0 }
 0x5cb   : > { %v3754_v49 = vadd.f32 %v4503_v58, %v3753_v24  ;;  %v3777_v30 = vmax.f32 %v3751_v4, 0.0 }
 0x5cc   : > { %v3780_v44 = vmax.f32 %v3762_v27, 0.0 }
 0x5cd   : > { %v3778_v3 = vmax.f32 %v3754_v49, 0.0 }
 0x5ce   : > { %v3788_v41 = vpack.c.bf16 %v3780_v44, %v3779_v0 }
 0x5cf   : > { %v3787_v57 = vpack.c.bf16 %v3778_v3, %v3777_v30 }
 0x5d1   : > { %5420 = vmatprep.mubr.bf16.mxu1 %v3787_v57 }
 0x5d2   : > { %5421 = vmatmul.mubr.bf16.gmra.mrb[172].mxu1 %v3788_v41 }
 0x5d3   : > { %5699 = shalt.err (!%p5696_p12)
}
 0x5d4   : > { %s6803_s10 = sld [smem:[#allocation16_spill]] }
 0x5da   : > { %s5700_s13 = scalar_lea.hbm %s6803_s10, 2048 }
 0x5db   : > { %p5701_p13 = scmp.ne.s32.totalorder %s6803_s10, %s5700_s13  ;;  %p5706_p2 = scmp.lt.u32.totalorder %s5700_s13, %s6803_s10 }
 0x5dd   : > { %p5702_p0 = pnand %p5701_p13, %p5494_p5 }
 0x5df   : > { %p5703_p1 = pneg %p5702_p0 }
 0x5e1   : > { %p5708_p3 = pnand %p5706_p2, %p5703_p1 }
 0x5e3   : > { %5711 = shalt.err (!%p5708_p3)
}
 0x5e4   : > { %s5726_s0 = smov 64   ;;  %s5727_s18 = smov 4   ;;  %v4512_v55 = vld [vmem:[%s718_s20] ss:$0 sm:$0xff] }
 0x5e5   : > { %5491 = dma.vmem_to_hbm [thread:$0]  (%p5494_p5), %s4207_s3, 2048, %s6803_s10, [#allocation3], %s5726_s0, %s5726_s0, %s5727_s18  }
 0x675   : > { %v5410_v34 = vpop.f32.mrb[160].mxu1 }
 0x676   : > { %v3903_v17 = vadd.f32 %v5410_v34, %v4512_v55  ;;  %v3894_v13 = vpop.f32.mrb[161].mxu1 }
 0x677   : > { %v3895_v23 = vadd.f32 %v4512_v55, %v3894_v13  ;;  %v5411_v51 = vpop.f32.mrb[162].mxu1 }
 0x678   : > { %v3906_v52 = vadd.f32 %v5411_v51, %v4512_v55  ;;  %v3897_v58 = vpop.f32.mrb[163].mxu1  ;;  %v3959_v53 = vmax.f32 %v3903_v17, 0.0 }
 0x679   : > { %v3898_v59 = vadd.f32 %v4512_v55, %v3897_v58  ;;  %v3957_v39 = vmax.f32 %v3895_v23, 0.0 }
 0x67a   : > { %v3960_v1 = vmax.f32 %v3906_v52, 0.0 }
 0x67b   : > { %v3958_v32 = vmax.f32 %v3898_v59, 0.0 }
 0x67c   : > { %v4634_v20 = vpack.c.bf16 %v3960_v1, %v3959_v53 }
 0x67d   : > { %v4629_v18 = vpack.c.bf16 %v3958_v32, %v3957_v39 }
 0x67e   : > { %4746 = vst [vmem:[%s6770_s17 + $0x8] sm:$0xff] %v4634_v20  }
 0x67f   : > { %4630 = vst [vmem:[%s6770_s17] sm:$0xff] %v4629_v18  }
 0x685   : > { %v5414_v29 = vpop.f32.mrb[164].mxu1 }
 0x686   : > { %v3919_v56 = vadd.f32 %v5414_v29, %v4512_v55  ;;  %v3910_v60 = vpop.f32.mrb[165].mxu1 }
 0x687   : > { %v3911_v62 = vadd.f32 %v4512_v55, %v3910_v60  ;;  %v5415_v6 = vpop.f32.mrb[166].mxu1 }
 0x688   : > { %v3922_v7 = vadd.f32 %v5415_v6, %v4512_v55  ;;  %v3913_v9 = vpop.f32.mrb[167].mxu1  ;;  %v3963_v12 = vmax.f32 %v3919_v56, 0.0 }
 0x689   : > { %v3914_v10 = vadd.f32 %v4512_v55, %v3913_v9  ;;  %v3961_v28 = vmax.f32 %v3911_v62, 0.0 }
 0x68a   : > { %v3964_v14 = vmax.f32 %v3922_v7, 0.0 }
 0x68b   : > { %v3962_v15 = vmax.f32 %v3914_v10, 0.0 }
 0x68c   : > { %v4644_v16 = vpack.c.bf16 %v3964_v14, %v3963_v12 }
 0x68d   : > { %v4639_v31 = vpack.c.bf16 %v3962_v15, %v3961_v28 }
 0x68e   : > { %4748 = vst [vmem:[%s6770_s17 + $0x18] sm:$0xff] %v4644_v16  }
 0x68f   : > { %4747 = vst [vmem:[%s6770_s17 + $0x10] sm:$0xff] %v4639_v31  }
 0x695   : > { %v5418_v19 = vpop.f32.mrb[168].mxu1 }
 0x696   : > { %v3935_v21 = vadd.f32 %v5418_v19, %v4512_v55  ;;  %v3926_v22 = vpop.f32.mrb[169].mxu1 }
 0x697   : > { %v3927_v25 = vadd.f32 %v4512_v55, %v3926_v22  ;;  %v5419_v35 = vpop.f32.mrb[170].mxu1 }
 0x698   : > { %v3938_v37 = vadd.f32 %v5419_v35, %v4512_v55  ;;  %v3929_v40 = vpop.f32.mrb[171].mxu1  ;;  %v3967_v43 = vmax.f32 %v3935_v21, 0.0 }
 0x699   : > { %v3930_v42 = vadd.f32 %v4512_v55, %v3929_v40  ;;  %v3965_v61 = vmax.f32 %v3927_v25, 0.0 }
 0x69a   : > { %v3968_v8 = vmax.f32 %v3938_v37, 0.0 }
 0x69b   : > { %v3966_v5 = vmax.f32 %v3930_v42, 0.0 }
 0x69c   : > { %v4654_v11 = vpack.c.bf16 %v3968_v8, %v3967_v43 }
 0x69d   : > { %v4649_v47 = vpack.c.bf16 %v3966_v5, %v3965_v61 }
 0x69e   : > { %4750 = vst [vmem:[%s6770_s17 + $0x28] sm:$0xff] %v4654_v11  }
 0x69f   : > { %4749 = vst [vmem:[%s6770_s17 + $0x20] sm:$0xff] %v4649_v47  }
 0x6a5   : > { %v5422_v48 = vpop.f32.mrb[172].mxu1 }
 0x6a6   : > { %v3951_v36 = vadd.f32 %v5422_v48, %v4512_v55  ;;  %v3942_v46 = vpop.f32.mrb[173].mxu1 }
 0x6a7   : > { %v3943_v33 = vadd.f32 %v4512_v55, %v3942_v46  ;;  %v5423_v26 = vpop.f32.mrb[174].mxu1 }
 0x6a8   : > { %v3954_v54 = vadd.f32 %v5423_v26, %v4512_v55  ;;  %v3945_v38 = vpop.f32.mrb[175].mxu1  ;;  %v3971_v50 = vmax.f32 %v3951_v36, 0.0 }
 0x6a9   : > { %v3946_v2 = vadd.f32 %v4512_v55, %v3945_v38  ;;  %v3969_v4 = vmax.f32 %v3943_v33, 0.0 }
 0x6aa   : > { %v3972_v45 = vmax.f32 %v3954_v54, 0.0 }
 0x6ab   : > { %v3970_v63 = vmax.f32 %v3946_v2, 0.0 }
 0x6ac   : > { %v4664_v27 = vpack.c.bf16 %v3972_v45, %v3971_v50 }
 0x6ad   : > { %v4659_v24 = vpack.c.bf16 %v3970_v63, %v3969_v4 }
 0x6ae   : > { %4752 = vst [vmem:[%s6770_s17 + $0x38] sm:$0xff] %v4664_v27  }
 0x6af   : > { %4751 = vst [vmem:[%s6770_s17 + $0x30] sm:$0xff] %v4659_v24  }
 0x6b0   : > { %5717 = dma.done.wait (%p5494_p5), [#allocation3], 2048  }
 0x6b1   : > { %5719 = vsyncadd (%p5494_p5), [#allocation3], 4294965248 }
 0x6b2 PF: > { %s6804_s3 = sld [smem:[#allocation5_spill]] }
 0x6b8   : > { %s30_s27 = sadd.s32 1, %s6804_s3  }
 0x6b9   : > { %p27_p4 = scmp.ge.s32.totalorder %s30_s27, 4  }
 0x6bb   :  { %29 = sbr.rel (!%p27_p4) target bundleno = 13 (0xd), region = 154 }
 0x6c2   :  { %4225 = vsyncpa [#allocation3], 1 }
 0x6c3   :  { %4227 = vsyncpa [#allocation3 + $0x1], 1 }

</bundles_post_ra>
